<compile_context>
chip_gen: v5e
topology: v5e:2x2
jax: 0.10.0
libtpu: 0.0.40
codegen_flags: <defaults>
</compile_context>

<pallas_src>
import functools

import jax
import jax.numpy as jnp
from jax.experimental import pallas as pl
from jax.experimental.pallas import tpu as pltpu


# ---------------------------------------------------------------------------
# Small numeric helpers (run on VPU/EUP inside the kernel).
# ---------------------------------------------------------------------------
def _layernorm(x, g, b, eps=1e-5):
    mu = jnp.mean(x, axis=-1, keepdims=True)
    var = jnp.mean((x - mu) ** 2, axis=-1, keepdims=True)
    return (x - mu) * jax.lax.rsqrt(var + eps) * g + b


def _gelu_tanh(x):
    # tanh-approximate GELU (EUP tanh).  PyTorch nn.GELU defaults to exact erf;
    # expect ~1e-3-level divergence.  TODO(synk): switch to erf form if exact parity
    # with a concrete PyTorch subclass is required.
    c = jnp.float32(0.7978845608028654)  # sqrt(2/pi)
    return 0.5 * x * (1.0 + jnp.tanh(c * (x + 0.044715 * x * x * x)))


# Packed row indices inside the [13, D] "vec" parameter block.
_B_EMBED, _LN1G, _LN1B, _BQ, _BK, _BV, _BO, _LN2G, _LN2B, _B2, _LNFG, _LNFB, _BH = range(13)


# ---------------------------------------------------------------------------
# Pallas kernel: full ViT-style forward for ONE batch element (grid over batch).
# ---------------------------------------------------------------------------
def vit_forward_kernel(
    patches_ref,                       # [1, N, Ppad]  f32
    w_embed_ref,                       # [Ppad, D]     bf16
    pos_ref,                           # [N, D]        f32
    vec_ref,                           # [13, D]       f32  (packed LN gains/biases & biases)
    wq_ref, wk_ref, wv_ref, wo_ref,    # [D, D]        bf16
    w1_ref,                            # [D, F]        bf16
    b1_ref,                            # [1, F]        f32
    w2_ref,                            # [F, D]        bf16
    wh_ref,                            # [D, Cpad]     bf16
    out_ref,                           # [1, 8, Cpad]  f32 (8 sublane-broadcast copies)
    *, num_heads: int,
):
    N = patches_ref.shape[1]
    D = w_embed_ref.shape[1]
    Dh = D // num_heads

    def vec(i):                        # one packed (1, D) parameter row (static slice)
        return vec_ref[i:i + 1, :]

    # ---- patch embedding + positional embedding --------------------------------------
    patches = patches_ref[0].astype(jnp.bfloat16)                        # [N, Ppad]
    x = jnp.dot(patches, w_embed_ref[...], preferred_element_type=jnp.float32)
    x = x + vec(_B_EMBED) + pos_ref[...]                                 # [N, D] f32

    # ---- transformer encoder block (pre-LN) ------------------------------------------
    h = _layernorm(x, vec(_LN1G), vec(_LN1B))
    hb = h.astype(jnp.bfloat16)
    q = jnp.dot(hb, wq_ref[...], preferred_element_type=jnp.float32) + vec(_BQ)
    k = jnp.dot(hb, wk_ref[...], preferred_element_type=jnp.float32) + vec(_BK)
    v = jnp.dot(hb, wv_ref[...], preferred_element_type=jnp.float32) + vec(_BV)
    kb = k.astype(jnp.bfloat16)

    scale = jnp.float32(1.0) / jnp.sqrt(jnp.float32(Dh))
    lane = jax.lax.broadcasted_iota(jnp.int32, (1, D), 1)                # lane ids
    ctx = jnp.zeros((N, D), jnp.float32)
    # Per-head attention via lane masks on full 128-lane operands: one operand of each
    # contraction is zeroed outside the head's lane range, so no lane sub-slicing /
    # relayout / concat is needed and the MXU always sees contraction depth D.
    for hd in range(num_heads):
        lo = hd * Dh
        mask = ((lane >= lo) & (lane < lo + Dh)).astype(jnp.float32)     # [1, D]
        qh = (q * mask).astype(jnp.bfloat16)                             # [N, D]
        vh = (v * mask).astype(jnp.bfloat16)                             # [N, D]
        s = jnp.einsum('nd,md->nm', qh, kb,
                       preferred_element_type=jnp.float32) * scale       # [N, N] f32
        m = jnp.max(s, axis=-1, keepdims=True)
        e = jnp.exp(s - m)
        p = e * pl.reciprocal(jnp.sum(e, axis=-1, keepdims=True), approx=True)
        ctx = ctx + jnp.einsum('nm,md->nd', p.astype(jnp.bfloat16), vh,
                               preferred_element_type=jnp.float32)       # fills head lanes

    attn_out = jnp.dot(ctx.astype(jnp.bfloat16), wo_ref[...],
                       preferred_element_type=jnp.float32) + vec(_BO)
    x = x + attn_out                                                     # residual 1 (f32)

    h2 = _layernorm(x, vec(_LN2G), vec(_LN2B))
    m1 = jnp.dot(h2.astype(jnp.bfloat16), w1_ref[...],
                 preferred_element_type=jnp.float32) + b1_ref[...]
    m1 = _gelu_tanh(m1)
    m2 = jnp.dot(m1.astype(jnp.bfloat16), w2_ref[...],
                 preferred_element_type=jnp.float32) + vec(_B2)
    x = x + m2                                                           # residual 2 (f32)

    # ---- final norm, mean pool over tokens, classifier head --------------------------
    xf = _layernorm(x, vec(_LNFG), vec(_LNFB))
    pooled = jnp.mean(xf, axis=0, keepdims=True)                         # [1, D]
    logits = jnp.dot(pooled.astype(jnp.bfloat16), wh_ref[...],
                     preferred_element_type=jnp.float32) + vec(_BH)      # [1, Cpad]
    # Broadcast over 8 sublanes so the output block stays (8,128)-aligned (unmasked vst).
    out_ref[...] = jnp.broadcast_to(logits, out_ref.shape).astype(out_ref.dtype)


# ---------------------------------------------------------------------------
# Wrapper: parameter setup, patchify (glue), pallas_call.
# ---------------------------------------------------------------------------
def make_params(key, *, pdim, dim, mlp_dim, num_tokens, num_classes_padded):
    ks = jax.random.split(key, 9)

    def init(k, shape, fan_in):
        w = jax.random.normal(k, shape, jnp.float32) / jnp.sqrt(jnp.float32(fan_in))
        return w.astype(jnp.bfloat16)          # weights live in bf16 (MXU operand dtype)

    zeros = jnp.zeros((1, dim), jnp.float32)
    ones = jnp.ones((1, dim), jnp.float32)
    # Packed [13, dim] lane-dense block: b_embed, ln1g, ln1b, bq, bk, bv, bo,
    # ln2g, ln2b, b2, lnfg, lnfb, bh (order matches the index constants above).
    vec = jnp.concatenate(
        [zeros, ones, zeros, zeros, zeros, zeros, zeros, ones, zeros, zeros, ones, zeros, zeros],
        axis=0)

    return dict(
        w_embed=init(ks[0], (pdim, dim), pdim),
        pos=0.02 * jax.random.normal(ks[1], (num_tokens, dim), jnp.float32),
        vec=vec,
        wq=init(ks[2], (dim, dim), dim),
        wk=init(ks[3], (dim, dim), dim),
        wv=init(ks[4], (dim, dim), dim),
        wo=init(ks[5], (dim, dim), dim),
        w1=init(ks[6], (dim, mlp_dim), dim),
        b1=jnp.zeros((1, mlp_dim), jnp.float32),
        w2=init(ks[7], (mlp_dim, dim), mlp_dim),
        wh=init(ks[8], (dim, num_classes_padded), dim),
    )


def patchify(x, patch, pad_to):
    # x: NCHW [B, C, H, W] -> [B, N, C*P*P] (stride-P conv patch embed), zero-padded on
    # the feature axis to `pad_to` lanes so every vreg row is lane-dense.
    B, C, H, W = x.shape
    gh, gw = H // patch, W // patch
    x = x.reshape(B, C, gh, patch, gw, patch)
    x = x.transpose(0, 2, 4, 1, 3, 5)                 # [B, gh, gw, C, P, P]
    p = x.reshape(B, gh * gw, C * patch * patch)
    pdim = C * patch * patch
    if pdim < pad_to:
        p = jnp.pad(p, ((0, 0), (0, 0), (0, pad_to - pdim)))
    return p


def _const_index_map(ndim):
    # Whole array resident in VMEM; same block every grid step -> no re-DMA.
    return lambda b: (0,) * ndim


@functools.partial(jax.jit, static_argnames=("num_heads", "num_classes"))
def vit_forward(patches, params, *, num_heads, num_classes):
    B, N, Ppad = patches.shape
    D = params["w_embed"].shape[1]
    F = params["w1"].shape[1]
    Cpad = params["wh"].shape[1]
    Dh = D // num_heads

    order = ["w_embed", "pos", "vec", "wq", "wk", "wv", "wo", "w1", "b1", "w2", "wh"]
    args = [patches] + [params[k] for k in order]

    in_specs = [pl.BlockSpec((1, N, Ppad), lambda b: (b, 0, 0))]
    in_specs += [pl.BlockSpec(params[k].shape, _const_index_map(params[k].ndim))
                 for k in order]
    out_specs = pl.BlockSpec((1, 8, Cpad), lambda b: (b, 0, 0))

    # Advisory cost estimate for XLA's scheduler.
    flops = 2 * B * (N * Ppad * D                      # patch embed
                     + 4 * N * D * D                   # q, k, v, o projections
                     + 2 * num_heads * N * N * D       # masked scores + contexts
                     + 2 * N * D * F                   # MLP
                     + D * Cpad)                       # classifier head
    transcendentals = B * (num_heads * N * N + N * F + 3 * N)
    bytes_accessed = int(sum(int(a.size) * a.dtype.itemsize for a in args)
                         + B * 8 * Cpad * 4)

    logits_pad = pl.pallas_call(
        functools.partial(vit_forward_kernel, num_heads=num_heads),
        grid=(B,),
        in_specs=in_specs,
        out_specs=out_specs,
        out_shape=jax.ShapeDtypeStruct((B, 8, Cpad), jnp.float32),
        compiler_params=pltpu.CompilerParams(
            dimension_semantics=("parallel",)),        # megacore sharding over batch
        cost_estimate=pl.CostEstimate(flops=flops,
                                      transcendentals=transcendentals,
                                      bytes_accessed=bytes_accessed),
    )(*args)
    # Drop the sublane broadcast and the class padding outside the kernel.
    return logits_pad[:, 0, :num_classes]


if __name__ == "__main__":
    # Small shapes consistent with an image-classification transformer, but with
    # lane-dense (>=128) feature dims per the performance guidance.
    B, C, H, W = 2, 4, 16, 16
    PATCH = 4
    DIM = 128          # model width (lane-dense)
    HEADS = 2          # -> Dh = 64
    MLP_DIM = 256
    NUM_CLASSES = 10
    N_TOKENS = (H // PATCH) * (W // PATCH)          # 16
    PDIM_PAD = 128                                  # C*P*P = 64, zero-padded to 128
    CLASSES_PAD = 128                               # 10 -> 128 inside the kernel

    key = jax.random.PRNGKey(0)
    k_x, k_p = jax.random.split(key)
    x = jax.random.normal(k_x, (B, C, H, W), jnp.float32)   # NCHW input (PyTorch layout)
    params = make_params(k_p, pdim=PDIM_PAD, dim=DIM, mlp_dim=MLP_DIM,
                         num_tokens=N_TOKENS, num_classes_padded=CLASSES_PAD)

    patches = patchify(x, PATCH, PDIM_PAD)                   # [2, 16, 128]
    logits = vit_forward(patches, params, num_heads=HEADS, num_classes=NUM_CLASSES)
    logits = jax.block_until_ready(logits)

    assert logits.shape == (B, NUM_CLASSES)
    assert bool(jnp.all(jnp.isfinite(logits)))
    print("KERNEL_OK")
</pallas_src>

<mosaic_0001>
module attributes {stable_mosaic.version = 11 : i64} {
  func.func @vit_forward_kernel(%arg0: i32, %arg1: memref<1x16x128xf32, #tpu.memory_space<vmem>>, %arg2: memref<128x128xbf16, #tpu.memory_space<vmem>>, %arg3: memref<16x128xf32, #tpu.memory_space<vmem>>, %arg4: memref<13x128xf32, #tpu.memory_space<vmem>>, %arg5: memref<128x128xbf16, #tpu.memory_space<vmem>>, %arg6: memref<128x128xbf16, #tpu.memory_space<vmem>>, %arg7: memref<128x128xbf16, #tpu.memory_space<vmem>>, %arg8: memref<128x128xbf16, #tpu.memory_space<vmem>>, %arg9: memref<128x256xbf16, #tpu.memory_space<vmem>>, %arg10: memref<1x256xf32, #tpu.memory_space<vmem>>, %arg11: memref<256x128xbf16, #tpu.memory_space<vmem>>, %arg12: memref<128x128xbf16, #tpu.memory_space<vmem>>, %arg13: memref<1x8x128xf32, #tpu.memory_space<vmem>>) attributes {dimension_semantics = [#tpu.dimension_semantics<parallel>], iteration_bounds = array<i64: 2>, scalar_prefetch = 0 : i64, scratch_operands = 0 : i64, tpu.core_type = #tpu.core_type<tc>, window_params = [{transform_indices = @transform_0, window_bounds = array<i64: 1, 16, 128>}, {pipeline_mode = #tpu.pipeline_mode<synchronous>, transform_indices = @transform_1, window_bounds = array<i64: 128, 128>}, {pipeline_mode = #tpu.pipeline_mode<synchronous>, transform_indices = @transform_2, window_bounds = array<i64: 16, 128>}, {pipeline_mode = #tpu.pipeline_mode<synchronous>, transform_indices = @transform_3, window_bounds = array<i64: 13, 128>}, {pipeline_mode = #tpu.pipeline_mode<synchronous>, transform_indices = @transform_4, window_bounds = array<i64: 128, 128>}, {pipeline_mode = #tpu.pipeline_mode<synchronous>, transform_indices = @transform_5, window_bounds = array<i64: 128, 128>}, {pipeline_mode = #tpu.pipeline_mode<synchronous>, transform_indices = @transform_6, window_bounds = array<i64: 128, 128>}, {pipeline_mode = #tpu.pipeline_mode<synchronous>, transform_indices = @transform_7, window_bounds = array<i64: 128, 128>}, {pipeline_mode = #tpu.pipeline_mode<synchronous>, transform_indices = @transform_8, window_bounds = array<i64: 128, 256>}, {pipeline_mode = #tpu.pipeline_mode<synchronous>, transform_indices = @transform_9, window_bounds = array<i64: 1, 256>}, {pipeline_mode = #tpu.pipeline_mode<synchronous>, transform_indices = @transform_10, window_bounds = array<i64: 256, 128>}, {pipeline_mode = #tpu.pipeline_mode<synchronous>, transform_indices = @transform_11, window_bounds = array<i64: 128, 128>}, {transform_indices = @transform_12, window_bounds = array<i64: 1, 8, 128>}]} {
    %c0 = arith.constant 0 : index
    %c0_0 = arith.constant 0 : index
    %c0_1 = arith.constant 0 : index
    %0 = vector.load %arg1[%c0, %c0_0, %c0_1] : memref<1x16x128xf32, #tpu.memory_space<vmem>>, vector<1x16x128xf32>
    %1 = vector.shape_cast %0 : vector<1x16x128xf32> to vector<16x128xf32>
    %2 = arith.truncf %1 : vector<16x128xf32> to vector<16x128xbf16>
    %c0_2 = arith.constant 0 : index
    %c0_3 = arith.constant 0 : index
    %3 = vector.load %arg2[%c0_2, %c0_3] : memref<128x128xbf16, #tpu.memory_space<vmem>>, vector<128x128xbf16>
    %cst = arith.constant dense<0.000000e+00> : vector<16x128xf32>
    %4 = tpu.matmul %2, %3, %cst {dimension_numbers = #tpu.dot_dimension_numbers<[1], [0], [0], [1], [0, 0, 1, 1], [], []>} : vector<16x128xbf16>, vector<128x128xbf16>, vector<16x128xf32> -> vector<16x128xf32>
    %c0_4 = arith.constant 0 : index
    %c0_5 = arith.constant 0 : index
    %5 = vector.load %arg4[%c0_4, %c0_5] : memref<13x128xf32, #tpu.memory_space<vmem>>, vector<1x128xf32>
    %6 = vector.broadcast %5 : vector<1x128xf32> to vector<16x128xf32>
    %7 = arith.addf %4, %6 : vector<16x128xf32>
    %c0_6 = arith.constant 0 : index
    %c0_7 = arith.constant 0 : index
    %8 = vector.load %arg3[%c0_6, %c0_7] : memref<16x128xf32, #tpu.memory_space<vmem>>, vector<16x128xf32>
    %9 = arith.addf %7, %8 : vector<16x128xf32>
    %c1 = arith.constant 1 : index
    %c0_8 = arith.constant 0 : index
    %10 = vector.load %arg4[%c1, %c0_8] : memref<13x128xf32, #tpu.memory_space<vmem>>, vector<1x128xf32>
    %c2 = arith.constant 2 : index
    %c0_9 = arith.constant 0 : index
    %11 = vector.load %arg4[%c2, %c0_9] : memref<13x128xf32, #tpu.memory_space<vmem>>, vector<1x128xf32>
    %cst_10 = arith.constant dense<0.000000e+00> : vector<16xf32>
    %12 = vector.multi_reduction <add>, %9, %cst_10 [1] : vector<16x128xf32> to vector<16xf32>
    %13 = vector.shape_cast %12 : vector<16xf32> to vector<16x1xf32>
    %cst_11 = arith.constant 1.280000e+02 : f32
    %14 = vector.broadcast %cst_11 : f32 to vector<16x1xf32>
    %15 = arith.divf %13, %14 : vector<16x1xf32>
    %16 = vector.broadcast %15 : vector<16x1xf32> to vector<16x128xf32>
    %17 = arith.subf %9, %16 : vector<16x128xf32>
    %18 = arith.mulf %17, %17 : vector<16x128xf32>
    %cst_12 = arith.constant dense<0.000000e+00> : vector<16xf32>
    %19 = vector.multi_reduction <add>, %18, %cst_12 [1] : vector<16x128xf32> to vector<16xf32>
    %20 = vector.shape_cast %19 : vector<16xf32> to vector<16x1xf32>
    %cst_13 = arith.constant 1.280000e+02 : f32
    %21 = vector.broadcast %cst_13 : f32 to vector<16x1xf32>
    %22 = arith.divf %20, %21 : vector<16x1xf32>
    %23 = vector.broadcast %15 : vector<16x1xf32> to vector<16x128xf32>
    %24 = arith.subf %9, %23 : vector<16x128xf32>
    %cst_14 = arith.constant 9.99999974E-6 : f32
    %25 = vector.broadcast %cst_14 : f32 to vector<16x1xf32>
    %26 = arith.addf %22, %25 : vector<16x1xf32>
    %27 = math.rsqrt %26 : vector<16x1xf32>
    %28 = vector.broadcast %27 : vector<16x1xf32> to vector<16x128xf32>
    %29 = arith.mulf %24, %28 : vector<16x128xf32>
    %30 = vector.broadcast %10 : vector<1x128xf32> to vector<16x128xf32>
    %31 = arith.mulf %29, %30 : vector<16x128xf32>
    %32 = vector.broadcast %11 : vector<1x128xf32> to vector<16x128xf32>
    %33 = arith.addf %31, %32 : vector<16x128xf32>
    %34 = arith.truncf %33 : vector<16x128xf32> to vector<16x128xbf16>
    %c0_15 = arith.constant 0 : index
    %c0_16 = arith.constant 0 : index
    %35 = vector.load %arg5[%c0_15, %c0_16] : memref<128x128xbf16, #tpu.memory_space<vmem>>, vector<128x128xbf16>
    %cst_17 = arith.constant dense<0.000000e+00> : vector<16x128xf32>
    %36 = tpu.matmul %34, %35, %cst_17 {dimension_numbers = #tpu.dot_dimension_numbers<[1], [0], [0], [1], [0, 0, 1, 1], [], []>} : vector<16x128xbf16>, vector<128x128xbf16>, vector<16x128xf32> -> vector<16x128xf32>
    %c3 = arith.constant 3 : index
    %c0_18 = arith.constant 0 : index
    %37 = vector.load %arg4[%c3, %c0_18] : memref<13x128xf32, #tpu.memory_space<vmem>>, vector<1x128xf32>
    %38 = vector.broadcast %37 : vector<1x128xf32> to vector<16x128xf32>
    %39 = arith.addf %36, %38 : vector<16x128xf32>
    %c0_19 = arith.constant 0 : index
    %c0_20 = arith.constant 0 : index
    %40 = vector.load %arg6[%c0_19, %c0_20] : memref<128x128xbf16, #tpu.memory_space<vmem>>, vector<128x128xbf16>
    %cst_21 = arith.constant dense<0.000000e+00> : vector<16x128xf32>
    %41 = tpu.matmul %34, %40, %cst_21 {dimension_numbers = #tpu.dot_dimension_numbers<[1], [0], [0], [1], [0, 0, 1, 1], [], []>} : vector<16x128xbf16>, vector<128x128xbf16>, vector<16x128xf32> -> vector<16x128xf32>
    %c4 = arith.constant 4 : index
    %c0_22 = arith.constant 0 : index
    %42 = vector.load %arg4[%c4, %c0_22] : memref<13x128xf32, #tpu.memory_space<vmem>>, vector<1x128xf32>
    %43 = vector.broadcast %42 : vector<1x128xf32> to vector<16x128xf32>
    %44 = arith.addf %41, %43 : vector<16x128xf32>
    %c0_23 = arith.constant 0 : index
    %c0_24 = arith.constant 0 : index
    %45 = vector.load %arg7[%c0_23, %c0_24] : memref<128x128xbf16, #tpu.memory_space<vmem>>, vector<128x128xbf16>
    %cst_25 = arith.constant dense<0.000000e+00> : vector<16x128xf32>
    %46 = tpu.matmul %34, %45, %cst_25 {dimension_numbers = #tpu.dot_dimension_numbers<[1], [0], [0], [1], [0, 0, 1, 1], [], []>} : vector<16x128xbf16>, vector<128x128xbf16>, vector<16x128xf32> -> vector<16x128xf32>
    %c5 = arith.constant 5 : index
    %c0_26 = arith.constant 0 : index
    %47 = vector.load %arg4[%c5, %c0_26] : memref<13x128xf32, #tpu.memory_space<vmem>>, vector<1x128xf32>
    %48 = vector.broadcast %47 : vector<1x128xf32> to vector<16x128xf32>
    %49 = arith.addf %46, %48 : vector<16x128xf32>
    %50 = arith.truncf %44 : vector<16x128xf32> to vector<16x128xbf16>
    %cst_27 = arith.constant 6.400000e+01 : f32
    %51 = math.sqrt %cst_27 : f32
    %cst_28 = arith.constant 1.000000e+00 : f32
    %52 = arith.divf %cst_28, %51 : f32
    %53 = tpu.iota {dimensions = array<i32: 1>} : vector<1x128xi32>
    %cst_29 = arith.constant 0.000000e+00 : f32
    %54 = vector.broadcast %cst_29 : f32 to vector<16x128xf32>
    %c0_i32 = arith.constant 0 : i32
    %55 = vector.broadcast %c0_i32 : i32 to vector<1x128xi32>
    %56 = arith.cmpi sge, %53, %55 : vector<1x128xi32>
    %c64_i32 = arith.constant 64 : i32
    %57 = vector.broadcast %c64_i32 : i32 to vector<1x128xi32>
    %58 = arith.cmpi slt, %53, %57 : vector<1x128xi32>
    %59 = arith.andi %56, %58 : vector<1x128xi1>
    %60 = arith.extui %59 : vector<1x128xi1> to vector<1x128xi32>
    %61 = arith.sitofp %60 : vector<1x128xi32> to vector<1x128xf32>
    %62 = vector.broadcast %61 : vector<1x128xf32> to vector<16x128xf32>
    %63 = arith.mulf %39, %62 : vector<16x128xf32>
    %64 = arith.truncf %63 : vector<16x128xf32> to vector<16x128xbf16>
    %65 = vector.broadcast %61 : vector<1x128xf32> to vector<16x128xf32>
    %66 = arith.mulf %49, %65 : vector<16x128xf32>
    %67 = arith.truncf %66 : vector<16x128xf32> to vector<16x128xbf16>
    "tpu.trace_start"() <{level = 10 : i32, message = "nd,md->nm"}> : () -> ()
    %cst_30 = arith.constant dense<0.000000e+00> : vector<16x16xf32>
    %68 = tpu.matmul %64, %50, %cst_30 {dimension_numbers = #tpu.dot_dimension_numbers<[1], [1], [0], [0], [0, 0, 1, 0], [], []>} : vector<16x128xbf16>, vector<16x128xbf16>, vector<16x16xf32> -> vector<16x16xf32>
    "tpu.trace_stop"() : () -> ()
    %69 = vector.broadcast %52 : f32 to vector<16x16xf32>
    %70 = arith.mulf %68, %69 : vector<16x16xf32>
    %cst_31 = arith.constant dense<0xFF800000> : vector<16xf32>
    %71 = vector.multi_reduction <maximumf>, %70, %cst_31 [1] : vector<16x16xf32> to vector<16xf32>
    %72 = vector.shape_cast %71 : vector<16xf32> to vector<16x1xf32>
    %73 = vector.broadcast %72 : vector<16x1xf32> to vector<16x16xf32>
    %74 = arith.subf %70, %73 : vector<16x16xf32>
    %75 = math.exp %74 : vector<16x16xf32>
    %cst_32 = arith.constant dense<0.000000e+00> : vector<16xf32>
    %76 = vector.multi_reduction <add>, %75, %cst_32 [1] : vector<16x16xf32> to vector<16xf32>
    %77 = vector.shape_cast %76 : vector<16xf32> to vector<16x1xf32>
    %78 = tpu.reciprocal %77 {approx = true} : vector<16x1xf32> -> vector<16x1xf32>
    %79 = vector.broadcast %78 : vector<16x1xf32> to vector<16x16xf32>
    %80 = arith.mulf %75, %79 : vector<16x16xf32>
    %81 = arith.truncf %80 : vector<16x16xf32> to vector<16x16xbf16>
    "tpu.trace_start"() <{level = 10 : i32, message = "nm,md->nd"}> : () -> ()
    %cst_33 = arith.constant dense<0.000000e+00> : vector<16x128xf32>
    %82 = tpu.matmul %81, %67, %cst_33 {dimension_numbers = #tpu.dot_dimension_numbers<[1], [0], [0], [1], [0, 0, 1, 1], [], []>} : vector<16x16xbf16>, vector<16x128xbf16>, vector<16x128xf32> -> vector<16x128xf32>
    "tpu.trace_stop"() : () -> ()
    %83 = arith.addf %54, %82 : vector<16x128xf32>
    %c64_i32_34 = arith.constant 64 : i32
    %84 = vector.broadcast %c64_i32_34 : i32 to vector<1x128xi32>
    %85 = arith.cmpi sge, %53, %84 : vector<1x128xi32>
    %c128_i32 = arith.constant 128 : i32
    %86 = vector.broadcast %c128_i32 : i32 to vector<1x128xi32>
    %87 = arith.cmpi slt, %53, %86 : vector<1x128xi32>
    %88 = arith.andi %85, %87 : vector<1x128xi1>
    %89 = arith.extui %88 : vector<1x128xi1> to vector<1x128xi32>
    %90 = arith.sitofp %89 : vector<1x128xi32> to vector<1x128xf32>
    %91 = vector.broadcast %90 : vector<1x128xf32> to vector<16x128xf32>
    %92 = arith.mulf %39, %91 : vector<16x128xf32>
    %93 = arith.truncf %92 : vector<16x128xf32> to vector<16x128xbf16>
    %94 = vector.broadcast %90 : vector<1x128xf32> to vector<16x128xf32>
    %95 = arith.mulf %49, %94 : vector<16x128xf32>
    %96 = arith.truncf %95 : vector<16x128xf32> to vector<16x128xbf16>
    "tpu.trace_start"() <{level = 10 : i32, message = "nd,md->nm"}> : () -> ()
    %cst_35 = arith.constant dense<0.000000e+00> : vector<16x16xf32>
    %97 = tpu.matmul %93, %50, %cst_35 {dimension_numbers = #tpu.dot_dimension_numbers<[1], [1], [0], [0], [0, 0, 1, 0], [], []>} : vector<16x128xbf16>, vector<16x128xbf16>, vector<16x16xf32> -> vector<16x16xf32>
    "tpu.trace_stop"() : () -> ()
    %98 = vector.broadcast %52 : f32 to vector<16x16xf32>
    %99 = arith.mulf %97, %98 : vector<16x16xf32>
    %cst_36 = arith.constant dense<0xFF800000> : vector<16xf32>
    %100 = vector.multi_reduction <maximumf>, %99, %cst_36 [1] : vector<16x16xf32> to vector<16xf32>
    %101 = vector.shape_cast %100 : vector<16xf32> to vector<16x1xf32>
    %102 = vector.broadcast %101 : vector<16x1xf32> to vector<16x16xf32>
    %103 = arith.subf %99, %102 : vector<16x16xf32>
    %104 = math.exp %103 : vector<16x16xf32>
    %cst_37 = arith.constant dense<0.000000e+00> : vector<16xf32>
    %105 = vector.multi_reduction <add>, %104, %cst_37 [1] : vector<16x16xf32> to vector<16xf32>
    %106 = vector.shape_cast %105 : vector<16xf32> to vector<16x1xf32>
    %107 = tpu.reciprocal %106 {approx = true} : vector<16x1xf32> -> vector<16x1xf32>
    %108 = vector.broadcast %107 : vector<16x1xf32> to vector<16x16xf32>
    %109 = arith.mulf %104, %108 : vector<16x16xf32>
    %110 = arith.truncf %109 : vector<16x16xf32> to vector<16x16xbf16>
    "tpu.trace_start"() <{level = 10 : i32, message = "nm,md->nd"}> : () -> ()
    %cst_38 = arith.constant dense<0.000000e+00> : vector<16x128xf32>
    %111 = tpu.matmul %110, %96, %cst_38 {dimension_numbers = #tpu.dot_dimension_numbers<[1], [0], [0], [1], [0, 0, 1, 1], [], []>} : vector<16x16xbf16>, vector<16x128xbf16>, vector<16x128xf32> -> vector<16x128xf32>
    "tpu.trace_stop"() : () -> ()
    %112 = arith.addf %83, %111 : vector<16x128xf32>
    %113 = arith.truncf %112 : vector<16x128xf32> to vector<16x128xbf16>
    %c0_39 = arith.constant 0 : index
    %c0_40 = arith.constant 0 : index
    %114 = vector.load %arg8[%c0_39, %c0_40] : memref<128x128xbf16, #tpu.memory_space<vmem>>, vector<128x128xbf16>
    %cst_41 = arith.constant dense<0.000000e+00> : vector<16x128xf32>
    %115 = tpu.matmul %113, %114, %cst_41 {dimension_numbers = #tpu.dot_dimension_numbers<[1], [0], [0], [1], [0, 0, 1, 1], [], []>} : vector<16x128xbf16>, vector<128x128xbf16>, vector<16x128xf32> -> vector<16x128xf32>
    %c6 = arith.constant 6 : index
    %c0_42 = arith.constant 0 : index
    %116 = vector.load %arg4[%c6, %c0_42] : memref<13x128xf32, #tpu.memory_space<vmem>>, vector<1x128xf32>
    %117 = vector.broadcast %116 : vector<1x128xf32> to vector<16x128xf32>
    %118 = arith.addf %115, %117 : vector<16x128xf32>
    %119 = arith.addf %9, %118 : vector<16x128xf32>
    %c7 = arith.constant 7 : index
    %c0_43 = arith.constant 0 : index
    %120 = vector.load %arg4[%c7, %c0_43] : memref<13x128xf32, #tpu.memory_space<vmem>>, vector<1x128xf32>
    %c8 = arith.constant 8 : index
    %c0_44 = arith.constant 0 : index
    %121 = vector.load %arg4[%c8, %c0_44] : memref<13x128xf32, #tpu.memory_space<vmem>>, vector<1x128xf32>
    %cst_45 = arith.constant dense<0.000000e+00> : vector<16xf32>
    %122 = vector.multi_reduction <add>, %119, %cst_45 [1] : vector<16x128xf32> to vector<16xf32>
    %123 = vector.shape_cast %122 : vector<16xf32> to vector<16x1xf32>
    %cst_46 = arith.constant 1.280000e+02 : f32
    %124 = vector.broadcast %cst_46 : f32 to vector<16x1xf32>
    %125 = arith.divf %123, %124 : vector<16x1xf32>
    %126 = vector.broadcast %125 : vector<16x1xf32> to vector<16x128xf32>
    %127 = arith.subf %119, %126 : vector<16x128xf32>
    %128 = arith.mulf %127, %127 : vector<16x128xf32>
    %cst_47 = arith.constant dense<0.000000e+00> : vector<16xf32>
    %129 = vector.multi_reduction <add>, %128, %cst_47 [1] : vector<16x128xf32> to vector<16xf32>
    %130 = vector.shape_cast %129 : vector<16xf32> to vector<16x1xf32>
    %cst_48 = arith.constant 1.280000e+02 : f32
    %131 = vector.broadcast %cst_48 : f32 to vector<16x1xf32>
    %132 = arith.divf %130, %131 : vector<16x1xf32>
    %133 = vector.broadcast %125 : vector<16x1xf32> to vector<16x128xf32>
    %134 = arith.subf %119, %133 : vector<16x128xf32>
    %cst_49 = arith.constant 9.99999974E-6 : f32
    %135 = vector.broadcast %cst_49 : f32 to vector<16x1xf32>
    %136 = arith.addf %132, %135 : vector<16x1xf32>
    %137 = math.rsqrt %136 : vector<16x1xf32>
    %138 = vector.broadcast %137 : vector<16x1xf32> to vector<16x128xf32>
    %139 = arith.mulf %134, %138 : vector<16x128xf32>
    %140 = vector.broadcast %120 : vector<1x128xf32> to vector<16x128xf32>
    %141 = arith.mulf %139, %140 : vector<16x128xf32>
    %142 = vector.broadcast %121 : vector<1x128xf32> to vector<16x128xf32>
    %143 = arith.addf %141, %142 : vector<16x128xf32>
    %144 = arith.truncf %143 : vector<16x128xf32> to vector<16x128xbf16>
    %c0_50 = arith.constant 0 : index
    %c0_51 = arith.constant 0 : index
    %145 = vector.load %arg9[%c0_50, %c0_51] : memref<128x256xbf16, #tpu.memory_space<vmem>>, vector<128x256xbf16>
    %cst_52 = arith.constant dense<0.000000e+00> : vector<16x256xf32>
    %146 = tpu.matmul %144, %145, %cst_52 {dimension_numbers = #tpu.dot_dimension_numbers<[1], [0], [0], [1], [0, 0, 1, 1], [], []>} : vector<16x128xbf16>, vector<128x256xbf16>, vector<16x256xf32> -> vector<16x256xf32>
    %c0_53 = arith.constant 0 : index
    %c0_54 = arith.constant 0 : index
    %147 = vector.load %arg10[%c0_53, %c0_54] : memref<1x256xf32, #tpu.memory_space<vmem>>, vector<1x256xf32>
    %148 = vector.broadcast %147 : vector<1x256xf32> to vector<16x256xf32>
    %149 = arith.addf %146, %148 : vector<16x256xf32>
    %cst_55 = arith.constant 5.000000e-01 : f32
    %150 = vector.broadcast %cst_55 : f32 to vector<16x256xf32>
    %151 = arith.mulf %150, %149 : vector<16x256xf32>
    %cst_56 = arith.constant 4.471500e-02 : f32
    %152 = vector.broadcast %cst_56 : f32 to vector<16x256xf32>
    %153 = arith.mulf %152, %149 : vector<16x256xf32>
    %154 = arith.mulf %153, %149 : vector<16x256xf32>
    %155 = arith.mulf %154, %149 : vector<16x256xf32>
    %156 = arith.addf %149, %155 : vector<16x256xf32>
    %cst_57 = arith.constant 0.797884583 : f32
    %157 = vector.broadcast %cst_57 : f32 to vector<16x256xf32>
    %158 = arith.mulf %157, %156 : vector<16x256xf32>
    %159 = math.tanh %158 : vector<16x256xf32>
    %cst_58 = arith.constant 1.000000e+00 : f32
    %160 = vector.broadcast %cst_58 : f32 to vector<16x256xf32>
    %161 = arith.addf %160, %159 : vector<16x256xf32>
    %162 = arith.mulf %151, %161 : vector<16x256xf32>
    %163 = arith.truncf %162 : vector<16x256xf32> to vector<16x256xbf16>
    %c0_59 = arith.constant 0 : index
    %c0_60 = arith.constant 0 : index
    %164 = vector.load %arg11[%c0_59, %c0_60] : memref<256x128xbf16, #tpu.memory_space<vmem>>, vector<256x128xbf16>
    %cst_61 = arith.constant dense<0.000000e+00> : vector<16x128xf32>
    %165 = tpu.matmul %163, %164, %cst_61 {dimension_numbers = #tpu.dot_dimension_numbers<[1], [0], [0], [1], [0, 0, 1, 1], [], []>} : vector<16x256xbf16>, vector<256x128xbf16>, vector<16x128xf32> -> vector<16x128xf32>
    %c9 = arith.constant 9 : index
    %c0_62 = arith.constant 0 : index
    %166 = vector.load %arg4[%c9, %c0_62] : memref<13x128xf32, #tpu.memory_space<vmem>>, vector<1x128xf32>
    %167 = vector.broadcast %166 : vector<1x128xf32> to vector<16x128xf32>
    %168 = arith.addf %165, %167 : vector<16x128xf32>
    %169 = arith.addf %119, %168 : vector<16x128xf32>
    %c10 = arith.constant 10 : index
    %c0_63 = arith.constant 0 : index
    %170 = vector.load %arg4[%c10, %c0_63] : memref<13x128xf32, #tpu.memory_space<vmem>>, vector<1x128xf32>
    %c11 = arith.constant 11 : index
    %c0_64 = arith.constant 0 : index
    %171 = vector.load %arg4[%c11, %c0_64] : memref<13x128xf32, #tpu.memory_space<vmem>>, vector<1x128xf32>
    %cst_65 = arith.constant dense<0.000000e+00> : vector<16xf32>
    %172 = vector.multi_reduction <add>, %169, %cst_65 [1] : vector<16x128xf32> to vector<16xf32>
    %173 = vector.shape_cast %172 : vector<16xf32> to vector<16x1xf32>
    %cst_66 = arith.constant 1.280000e+02 : f32
    %174 = vector.broadcast %cst_66 : f32 to vector<16x1xf32>
    %175 = arith.divf %173, %174 : vector<16x1xf32>
    %176 = vector.broadcast %175 : vector<16x1xf32> to vector<16x128xf32>
    %177 = arith.subf %169, %176 : vector<16x128xf32>
    %178 = arith.mulf %177, %177 : vector<16x128xf32>
    %cst_67 = arith.constant dense<0.000000e+00> : vector<16xf32>
    %179 = vector.multi_reduction <add>, %178, %cst_67 [1] : vector<16x128xf32> to vector<16xf32>
    %180 = vector.shape_cast %179 : vector<16xf32> to vector<16x1xf32>
    %cst_68 = arith.constant 1.280000e+02 : f32
    %181 = vector.broadcast %cst_68 : f32 to vector<16x1xf32>
    %182 = arith.divf %180, %181 : vector<16x1xf32>
    %183 = vector.broadcast %175 : vector<16x1xf32> to vector<16x128xf32>
    %184 = arith.subf %169, %183 : vector<16x128xf32>
    %cst_69 = arith.constant 9.99999974E-6 : f32
    %185 = vector.broadcast %cst_69 : f32 to vector<16x1xf32>
    %186 = arith.addf %182, %185 : vector<16x1xf32>
    %187 = math.rsqrt %186 : vector<16x1xf32>
    %188 = vector.broadcast %187 : vector<16x1xf32> to vector<16x128xf32>
    %189 = arith.mulf %184, %188 : vector<16x128xf32>
    %190 = vector.broadcast %170 : vector<1x128xf32> to vector<16x128xf32>
    %191 = arith.mulf %189, %190 : vector<16x128xf32>
    %192 = vector.broadcast %171 : vector<1x128xf32> to vector<16x128xf32>
    %193 = arith.addf %191, %192 : vector<16x128xf32>
    %cst_70 = arith.constant dense<0.000000e+00> : vector<128xf32>
    %194 = vector.multi_reduction <add>, %193, %cst_70 [0] : vector<16x128xf32> to vector<128xf32>
    %195 = vector.shape_cast %194 : vector<128xf32> to vector<1x128xf32>
    %cst_71 = arith.constant 1.600000e+01 : f32
    %196 = vector.broadcast %cst_71 : f32 to vector<1x128xf32>
    %197 = arith.divf %195, %196 : vector<1x128xf32>
    %198 = arith.truncf %197 : vector<1x128xf32> to vector<1x128xbf16>
    %c0_72 = arith.constant 0 : index
    %c0_73 = arith.constant 0 : index
    %199 = vector.load %arg12[%c0_72, %c0_73] : memref<128x128xbf16, #tpu.memory_space<vmem>>, vector<128x128xbf16>
    %cst_74 = arith.constant dense<0.000000e+00> : vector<1x128xf32>
    %200 = tpu.matmul %198, %199, %cst_74 {dimension_numbers = #tpu.dot_dimension_numbers<[1], [0], [0], [1], [0, 0, 1, 1], [], []>} : vector<1x128xbf16>, vector<128x128xbf16>, vector<1x128xf32> -> vector<1x128xf32>
    %c12 = arith.constant 12 : index
    %c0_75 = arith.constant 0 : index
    %201 = vector.load %arg4[%c12, %c0_75] : memref<13x128xf32, #tpu.memory_space<vmem>>, vector<1x128xf32>
    %202 = arith.addf %200, %201 : vector<1x128xf32>
    %203 = vector.shape_cast %202 : vector<1x128xf32> to vector<1x1x128xf32>
    %204 = vector.broadcast %203 : vector<1x1x128xf32> to vector<1x8x128xf32>
    %c0_76 = arith.constant 0 : index
    %c0_77 = arith.constant 0 : index
    %c0_78 = arith.constant 0 : index
    %205 = vector.load %arg13[%c0_76, %c0_77, %c0_78] : memref<1x8x128xf32, #tpu.memory_space<vmem>>, vector<1x8x128xf32>
    tpu.vector_store %arg13[%c0_76, %c0_77, %c0_78], %204 {strides = array<i32>} : memref<1x8x128xf32, #tpu.memory_space<vmem>>, vector<1x8x128xf32>,
    return
  }
  func.func @transform_0(%arg0: i32) -> (i32, i32, i32) {
    %c0_i32 = arith.constant 0 : i32
    %c0_i32_0 = arith.constant 0 : i32
    %c0_i32_1 = arith.constant 0 : i32
    return %arg0, %c0_i32, %c0_i32_0 : i32, i32, i32
  }
  func.func @transform_1(%arg0: i32) -> (i32, i32) {
    %c0_i32 = arith.constant 0 : i32
    %c0_i32_0 = arith.constant 0 : i32
    %c0_i32_1 = arith.constant 0 : i32
    return %c0_i32, %c0_i32_0 : i32, i32
  }
  func.func @transform_2(%arg0: i32) -> (i32, i32) {
    %c0_i32 = arith.constant 0 : i32
    %c0_i32_0 = arith.constant 0 : i32
    %c0_i32_1 = arith.constant 0 : i32
    return %c0_i32, %c0_i32_0 : i32, i32
  }
  func.func @transform_3(%arg0: i32) -> (i32, i32) {
    %c0_i32 = arith.constant 0 : i32
    %c0_i32_0 = arith.constant 0 : i32
    %c0_i32_1 = arith.constant 0 : i32
    return %c0_i32, %c0_i32_0 : i32, i32
  }
  func.func @transform_4(%arg0: i32) -> (i32, i32) {
    %c0_i32 = arith.constant 0 : i32
    %c0_i32_0 = arith.constant 0 : i32
    %c0_i32_1 = arith.constant 0 : i32
    return %c0_i32, %c0_i32_0 : i32, i32
  }
  func.func @transform_5(%arg0: i32) -> (i32, i32) {
    %c0_i32 = arith.constant 0 : i32
    %c0_i32_0 = arith.constant 0 : i32
    %c0_i32_1 = arith.constant 0 : i32
    return %c0_i32, %c0_i32_0 : i32, i32
  }
  func.func @transform_6(%arg0: i32) -> (i32, i32) {
    %c0_i32 = arith.constant 0 : i32
    %c0_i32_0 = arith.constant 0 : i32
    %c0_i32_1 = arith.constant 0 : i32
    return %c0_i32, %c0_i32_0 : i32, i32
  }
  func.func @transform_7(%arg0: i32) -> (i32, i32) {
    %c0_i32 = arith.constant 0 : i32
    %c0_i32_0 = arith.constant 0 : i32
    %c0_i32_1 = arith.constant 0 : i32
    return %c0_i32, %c0_i32_0 : i32, i32
  }
  func.func @transform_8(%arg0: i32) -> (i32, i32) {
    %c0_i32 = arith.constant 0 : i32
    %c0_i32_0 = arith.constant 0 : i32
    %c0_i32_1 = arith.constant 0 : i32
    return %c0_i32, %c0_i32_0 : i32, i32
  }
  func.func @transform_9(%arg0: i32) -> (i32, i32) {
    %c0_i32 = arith.constant 0 : i32
    %c0_i32_0 = arith.constant 0 : i32
    %c0_i32_1 = arith.constant 0 : i32
    return %c0_i32, %c0_i32_0 : i32, i32
  }
  func.func @transform_10(%arg0: i32) -> (i32, i32) {
    %c0_i32 = arith.constant 0 : i32
    %c0_i32_0 = arith.constant 0 : i32
    %c0_i32_1 = arith.constant 0 : i32
    return %c0_i32, %c0_i32_0 : i32, i32
  }
  func.func @transform_11(%arg0: i32) -> (i32, i32) {
    %c0_i32 = arith.constant 0 : i32
    %c0_i32_0 = arith.constant 0 : i32
    %c0_i32_1 = arith.constant 0 : i32
    return %c0_i32, %c0_i32_0 : i32, i32
  }
  func.func @transform_12(%arg0: i32) -> (i32, i32, i32) {
    %c0_i32 = arith.constant 0 : i32
    %c0_i32_0 = arith.constant 0 : i32
    %c0_i32_1 = arith.constant 0 : i32
    return %arg0, %c0_i32, %c0_i32_0 : i32, i32, i32
  }
}

</mosaic_0001>

<bundles_post_ra>
// kernel: vit_forward.1
= control target key start
LH: loop header
LB: loop body
LE: loop exit
PB: predicated region body
PF: predicated region fallthrough
CT: control target
= control target key end

     0   :  { %s3346_s0 = inlined_call_operand.hbm [shape: f32[2,16,128], index: 0, kind: input, shape index: {}]   ;;  %s3347_s1 = inlined_call_operand.hbm [shape: bf16[128,128], index: 1, kind: input, shape index: {}]   ;;  %s3348_s2 = inlined_call_operand.hbm [shape: f32[16,128], index: 2, kind: input, shape index: {}]   ;;  %s3349_s3 = inlined_call_operand.hbm [shape: f32[13,128], index: 3, kind: input, shape index: {}]   ;;  %s3350_s4 = inlined_call_operand.hbm [shape: bf16[128,128], index: 4, kind: input, shape index: {}]   ;;  %s3351_s5 = inlined_call_operand.hbm [shape: bf16[128,128], index: 5, kind: input, shape index: {}]   ;;  %s3352_s6 = inlined_call_operand.hbm [shape: bf16[128,128], index: 6, kind: input, shape index: {}]   ;;  %s3353_s7 = inlined_call_operand.hbm [shape: bf16[128,128], index: 7, kind: input, shape index: {}]   ;;  %s3354_s8 = inlined_call_operand.hbm [shape: bf16[128,256], index: 8, kind: input, shape index: {}]   ;;  %s3355_s9 = inlined_call_operand.hbm [shape: f32[1,256], index: 9, kind: input, shape index: {}]   ;;  %s3356_s10 = inlined_call_operand.hbm [shape: bf16[256,128], index: 10, kind: input, shape index: {}]   ;;  %s3357_s11 = inlined_call_operand.hbm [shape: bf16[128,128], index: 11, kind: input, shape index: {}]   ;;  %s3358_s12 = inlined_call_operand.vmem [shape: f32[2,8,128], index: 12, kind: output, shape index: {}]  }
   0x1   :  { %3362 = sst [smem:[#allocation29_spill]] %s3347_s1 }
   0x2   :  { %3363 = sst [smem:[#allocation30_spill]] %s3349_s3 }
   0x3   :  { %3364 = sst [smem:[#allocation31_spill]] %s3351_s5 }
   0x4   :  { %3365 = sst [smem:[#allocation32_spill]] %s3358_s12 }
   0x5   :  { %17 = vsyncpa [#allocation3], 0 }
   0x6   :  { %19 = vsyncpa [#allocation3 + $0x1], 0 }
   0x7   :  { %20 = vsyncpa [#allocation5], 0 }
   0x8   :  { %21 = vsyncpa [#allocation8], 0 }
   0x9   :  { %22 = vsyncpa [#allocation11], 0 }
   0xa   :  { %23 = vsyncpa [#allocation14], 0 }
   0xb   :  { %24 = vsyncpa [#allocation17], 0 }
   0xc   :  { %25 = vsyncpa [#allocation20], 0  ;;  %s3060_s21 = smov 0   ;;  %s3062_s22 = smov 0  }
   0xd   :  { %s3064_s23 = smov 0   ;;  %s3066_s24 = smov 0  }
   0xe LB: > { %s3366_s1 = sld [smem:[#allocation29_spill]]  ;;  %s3084_s28 = sadd.s32 4294967295, %s2975_s24   ;;  %s2975_s24 = sphi %s3066_s24, %s3380_s24   ;;  %s2971_s23 = sphi %s3064_s23, %s3379_s23   ;;  %s2967_s22 = sphi %s3062_s22, %s3378_s22   ;;  %s2963_s21 = sphi %s3060_s21, %s3377_s21  }
   0xf   : > { %p1911_p0 = scmp.ge.s32.totalorder %s2975_s24, 1  ;;  %p52_p1 = scmp.eq.s32.totalorder %s3084_s28, 0 }
  0x10   : > { %p319_p2 = scmp.lt.s32.totalorder %s2975_s24, 3  ;;  %s2977_s30 = smov [#allocation4]  }
  0x11   : > { %s332_s13 = sshll.u32 %s2977_s30, 4  ;;  %s3370_s3 = sld [smem:[#allocation30_spill]]  ;;  %s333_s13 = int_to_ptr.vmem [resolvable:$true] %s332_s13 }
  0x12   : > { %p3089_p3 = pnand %p1911_p0, %p319_p2  ;;  %s2978_s18 = smov 64  }
  0x13   : > { %s2979_s19 = smov 4   ;;  %s2980_s20 = smov [#allocation7]  }
  0x14   : > { %s330_s27 = sshll.u32 %s3366_s1, 4  ;;  %p2394_p4 = pneg %p3089_p3  ;;  %s331_s27 = int_to_ptr.hbm [resolvable:$true] %s330_s27 }
  0x15   : > { %s3367_s29 = scalar_select %p3089_p3, 1, 0 }
  0x16   : > { %p3097_p5 = pnand %p2394_p4, %p52_p1  ;;  %s360_s25 = sshll.u32 %s2980_s20, 4  ;;  %s361_s25 = int_to_ptr.vmem [resolvable:$true] %s360_s25 }
  0x17   : > { %3368 = sst [smem:[#allocation28_spill]] %s3367_s29  ;;  %s358_s17 = sshll.u32 %s3370_s3, 4  ;;  %s359_s17 = int_to_ptr.hbm [resolvable:$true] %s358_s17 }
  0x18   : > { %2397 = dma.hbm_to_vmem [thread:$0]  (!%p3097_p5), %s331_s27, 1024, %s333_s13, [#allocation5], %s2978_s18, %s2978_s18, %s2979_s19  }
  0x19   : > { %s3371_s5 = sld [smem:[#allocation31_spill]]  ;;  %s3360_s15 = smov 128  }
  0x1a   : > { %s2982_s16 = smov 8   ;;  %s414_s27 = sshll.u32 %s3353_s7, 4  ;;  %s415_s27 = int_to_ptr.hbm [resolvable:$true] %s414_s27 }
  0x1b   : > { %2403 = dma.hbm_to_vmem [thread:$0]  (!%p3097_p5), %s359_s17, 256, %s361_s25, [#allocation8], %s3360_s15, %s3360_s15, %s2982_s16  }
  0x1c   : > { %s2983_s13 = smov [#allocation10]   ;;  %s2984_s26 = smov [#allocation13]  }
  0x1d   : > { %s388_s20 = sshll.u32 %s2983_s13, 4  ;;  %s416_s30 = sshll.u32 %s2984_s26, 4  ;;  %s389_s20 = int_to_ptr.vmem [resolvable:$true] %s388_s20  ;;  %s417_s30 = int_to_ptr.vmem [resolvable:$true] %s416_s30 }
  0x1e   : > { %s443_s17 = sshll.u32 %s3355_s9, 4  ;;  %s344_s25 = sshll.u32 %s3348_s2, 4  ;;  %s444_s17 = int_to_ptr.hbm [resolvable:$true] %s443_s17  ;;  %s345_s25 = int_to_ptr.hbm [resolvable:$true] %s344_s25 }
  0x1f   : > { %s386_s1 = sshll.u32 %s3371_s5, 4  ;;  %s2985_s13 = smov [#allocation16]   ;;  %s387_s1 = int_to_ptr.hbm [resolvable:$true] %s386_s1 }
  0x20   : > { %2409 = dma.hbm_to_vmem [thread:$0]  (!%p3097_p5), %s387_s1, 1024, %s389_s20, [#allocation11], %s2978_s18, %s2978_s18, %s2979_s19  }
  0x21   : > { %2415 = dma.hbm_to_vmem [thread:$0]  (!%p3097_p5), %s415_s27, 1024, %s417_s30, [#allocation14], %s2978_s18, %s2978_s18, %s2979_s19  }
  0x22   : > { %s445_s1 = sshll.u32 %s2985_s13, 4  ;;  %s2986_s5 = smov [#allocation6]   ;;  %s446_s1 = int_to_ptr.vmem [resolvable:$true] %s445_s1 }
  0x23   : > { %2421 = dma.hbm_to_vmem [thread:$0]  (!%p3097_p5), %s444_s17, 32, %s446_s1, [#allocation17]  }
  0x24   : > { %s346_s29 = sshll.u32 %s2986_s5, 4  ;;  %s372_s15 = sshll.u32 %s3350_s4, 4  ;;  %s347_s29 = int_to_ptr.vmem [resolvable:$true] %s346_s29  ;;  %s373_s15 = int_to_ptr.hbm [resolvable:$true] %s372_s15 }
  0x25   : > { %s3372_s27 = smov 128   ;;  %s400_s12 = sshll.u32 %s3352_s6, 4  ;;  %s401_s12 = int_to_ptr.hbm [resolvable:$true] %s400_s12 }
  0x26   : > { %2400 = dma.hbm_to_vmem [thread:$0]  (!%p3097_p5), %s345_s25, 256, %s347_s29, [#allocation5], %s3372_s27, %s3372_s27, %s2982_s16  }
  0x27   : > { %s2987_s13 = smov [#allocation9]   ;;  %s2988_s1 = smov [#allocation12]  }
  0x28   : > { %s374_s17 = sshll.u32 %s2987_s13, 4  ;;  %s402_s5 = sshll.u32 %s2988_s1, 4  ;;  %s375_s17 = int_to_ptr.vmem [resolvable:$true] %s374_s17  ;;  %s403_s5 = int_to_ptr.vmem [resolvable:$true] %s402_s5 }
  0x29   : > { %2406 = dma.hbm_to_vmem [thread:$0]  (!%p3097_p5), %s373_s15, 1024, %s375_s17, [#allocation8], %s2978_s18, %s2978_s18, %s2979_s19  }
  0x2a   : > { %s428_s25 = sshll.u32 %s3354_s8, 4  ;;  %s454_s3 = sshll.u32 %s3356_s10, 4  ;;  %s429_s25 = int_to_ptr.hbm [resolvable:$true] %s428_s25  ;;  %s455_s3 = int_to_ptr.hbm [resolvable:$true] %s454_s3 }
  0x2b   : > { %2412 = dma.hbm_to_vmem [thread:$0]  (!%p3097_p5), %s401_s12, 1024, %s403_s5, [#allocation11], %s2978_s18, %s2978_s18, %s2979_s19  }
  0x2c   : > { %s2989_s15 = smov [#allocation15]   ;;  %s2990_s12 = smov [#allocation18]  }
  0x2d   : > { %s430_s13 = sshll.u32 %s2989_s15, 4  ;;  %s456_s17 = sshll.u32 %s2990_s12, 4  ;;  %s431_s13 = int_to_ptr.vmem [resolvable:$true] %s430_s13  ;;  %s457_s17 = int_to_ptr.vmem [resolvable:$true] %s456_s17 }
  0x2e   : > { %2418 = dma.hbm_to_vmem [thread:$0]  (!%p3097_p5), %s429_s25, 2048, %s431_s13, [#allocation14], %s3372_s27, %s3372_s27, %s2982_s16  }
  0x2f   : > { %s468_s20 = sshll.u32 %s3357_s11, 4  ;;  %s2991_s26 = smov [#allocation19]   ;;  %s469_s20 = int_to_ptr.hbm [resolvable:$true] %s468_s20 }
  0x30   : > { %2424 = dma.hbm_to_vmem [thread:$0]  (!%p3097_p5), %s455_s3, 2048, %s457_s17, [#allocation17], %s2978_s18, %s2978_s18, %s2979_s19  }
  0x31   : > { %s470_s25 = sshll.u32 %s2991_s26, 4  ;;  %s3184_s29 = sadd.s32 1, %s2975_s24   ;;  %s471_s25 = int_to_ptr.vmem [resolvable:$true] %s470_s25 }
  0x32   : > { %2427 = dma.hbm_to_vmem [thread:$0]  (!%p3097_p5), %s469_s20, 1024, %s471_s25, [#allocation20], %s2978_s18, %s2978_s18, %s2979_s19  }
  0x33   : > { %s35_s30 = ssub.s32 %s2975_s24, %s3184_s29  ;;  %s38_s15 = sadd.s32 1, %s2971_s23 }
  0x34   : > { %p36_p6 = scmp.eq.s32.totalorder %s35_s30, 0  ;;  %p45_p7 = scmp.ne.s32.totalorder %s2971_s23, %s2967_s22 }
  0x35   : > { %p46_p8 = scmp.eq.s32.totalorder %s2975_s24, 0  ;;  %p51_p9 = scmp.ne.s32.totalorder %s2967_s22, %s2963_s21 }
  0x36   : > { %s3195_s3 = scalar_select %p36_p6, %s2971_s23, %s38_s15  }
  0x37   : > { %p47_p10 = por %p46_p8, %p45_p7  ;;  %p3199_p11 = por %p52_p1, %p51_p9 }
  0x38   : > { %p2443_p12 = scmp.lt.s32.totalorder %s2975_s24, 2  ;;  %s484_s14 = sand.u32 1, %s2971_s23  }
  0x39   : > { %s1924_s18 = sshll.u32 %s484_s14, 4  ;;  %s2267_s19 = sshll.u32 %s2975_s24, 4 }
  0x3a   : > { %s493_s1 = scalar_lea.hbm %s3346_s0, %s2267_s19  ;;  %s488_s5 = scalar_lea.vmem [#allocation2], %s1924_s18 }
  0x3b   : > { %s496_s20 = sshll.u32 %s488_s5, 4  ;;  %s494_s26 = sshll.u32 %s493_s1, 4  ;;  %s497_s20 = int_to_ptr.vmem [resolvable:$true] %s496_s20  ;;  %s495_s26 = int_to_ptr.hbm [resolvable:$true] %s494_s26 }
  0x3c   : > { %p3209_p13 = pnand %p2443_p12, %p47_p10  ;;  %s485_s25 = scalar_lea.sflag [#allocation3], %s484_s14 }
  0x3d   : > { %s2887_s30 = sshra.s32 %s495_s26, 4  ;;  %s2894_s19 = scalar_lea.hbm %s3346_s0, 32  ;;  %s2888_s30 = int_to_ptr.hbm [resolvable:$true] %s2887_s30 }
  0x3e   : > { %s2889_s15 = scalar_lea.hbm %s2888_s30, 16  ;;  %p2891_p2 = pneg %p3209_p13 }
  0x3f   : > { %p2890_p0 = scmp.ne.s32.totalorder %s2888_s30, %s2889_s15  ;;  %p2895_p6 = scmp.lt.s32.totalorder %s2888_s30, %s3346_s0 }
  0x40   : > { %p2896_p7 = scmp.lt.s32.totalorder %s2894_s19, %s2889_s15 }
  0x41   : > { %p2892_p4 = pnand %p2891_p2, %p2890_p0 }
  0x42   : > { %p2897_p8 = por %p2896_p7, %p2895_p6 }
  0x43   : > { %p2893_p5 = pneg %p2892_p4 }
  0x45   : > { %p2898_p9 = pnand %p2897_p8, %p2893_p5 }
  0x47   : > { %2901 = shalt.err (!%p2898_p9)
}
  0x48   : > { %2431 = dma.hbm_to_vmem [thread:$0]  (!%p3209_p13), %s495_s26, 256, %s497_s20, %s485_s25, %s3372_s27, %s3372_s27, %s2982_s16  }
  0x49   : > { %508 = sbr.rel (%p3089_p3) target bundleno = 2353 (0x931), region = 68  ;;  %s510_s1 = sand.u32 (!%p3089_p3), 1, %s2967_s22  }
  0x4a   : > { %s3229_s5 = sshll.u32 (!%p3089_p3), %s510_s1, 4  ;;  %s511_s30 = scalar_lea.sflag (!%p3089_p3), [#allocation3], %s510_s1 }
  0x4b   : > { %s514_s15 = scalar_lea.vmem (!%p3089_p3), [#allocation2], %s3229_s5 }
  0x4e   : > { %2934 = dma.done.wait (%p3199_p11), %s511_s30, 256  }
  0x4f   : > { %2936 = vsyncadd (%p3199_p11), %s511_s30, 4294967040 }
  0x50   : > { %2938 = dma.done.wait (%p52_p1), [#allocation5], 1280  }
  0x51   : > { %2940 = vsyncadd (%p52_p1), [#allocation5], 4294966016 }
  0x52   : > { %2942 = dma.done.wait (%p52_p1), [#allocation8], 1280  }
  0x53   : > { %2944 = vsyncadd (%p52_p1), [#allocation8], 4294966016 }
  0x54   : > { %2946 = dma.done.wait (%p52_p1), [#allocation11], 2048  }
  0x55   : > { %2948 = vsyncadd (%p52_p1), [#allocation11], 4294965248 }
  0x56   : > { %2950 = dma.done.wait (%p52_p1), [#allocation14], 3072  }
  0x57   : > { %2952 = vsyncadd (%p52_p1), [#allocation14], 4294964224 }
  0x58   : > { %2954 = dma.done.wait (%p52_p1), [#allocation17], 2080  }
  0x59   : > { %2956 = vsyncadd (%p52_p1), [#allocation17], 4294965216 }
  0x5a   : > { %2958 = dma.done.wait (%p52_p1), [#allocation20], 1024  }
  0x5b   : > { %2960 = vsyncadd (%p52_p1), [#allocation20], 4294966272  ;;  %v2275_v0 = vld [vmem:[#allocation4 + $0x38] sm:$0xff]  ;;  %v2274_v1 = vld [vmem:[#allocation4 + $0x30] sm:$0xff]  ;;  %v2992_v20 = vmov 128.0   ;;  %vm1028_vm9 = vcmask 130048  }
  0x5c   : > { %684 = vmatpush.bf16.msra.mxu0 %v2275_v0  ;;  %v2273_v2 = vld [vmem:[#allocation4 + $0x28] sm:$0xff]  ;;  %v2272_v3 = vld [vmem:[#allocation4 + $0x20] sm:$0xff]  ;;  %v2271_v4 = vld [vmem:[#allocation4 + $0x18] sm:$0xff]  ;;  %2517 = vrcp.f32 %v2992_v20  ;;  %p610_p1 = scmp.lt.s32.totalorder %s3084_s28, 1  ;;  %s3376_s20 = sld [smem:[#allocation32_spill]] }
  0x5d   : > { %v2270_v5 = vld [vmem:[#allocation4 + $0x10] sm:$0xff]  ;;  %v2269_v6 = vld [vmem:[#allocation4 + $0x8] sm:$0xff]  ;;  %v2268_v7 = vld [vmem:[#allocation4] sm:$0xff] }
  0x5e   : > { %v615_v8 = vld [vmem:[%s514_s15] sm:$0xff]  ;;  %v616_v9 = vld [vmem:[%s514_s15 + $0x8] sm:$0xff]  ;;  %s3382_s28 = smov (!%p610_p1, %s3084_s28), 1 }
  0x5f   : > { %v617_v10 = vpack.c.bf16 %v616_v9, %v615_v8  ;;  %v2505_v11 = vld [vmem:[#allocation7] ss:$0 sm:$0xff]  ;;  %v698_v13 = vld [vmem:[#allocation6] sm:$0xff]  ;;  %v699_v17 = vld [vmem:[#allocation6 + $0x8] sm:$0xff]  ;;  %s1940_s16 = sshll.u32 %s3382_s28, 3 }
  0x60   : > { %685 = vmatpush.bf16.msra.mxu0 %v2274_v1  ;;  %v2283_v35 = vld [vmem:[#allocation9 + $0x38] sm:$0xff]  ;;  %v2282_v38 = vld [vmem:[#allocation9 + $0x30] sm:$0xff]  ;;  %v2281_v41 = vld [vmem:[#allocation9 + $0x28] sm:$0xff] }
  0x61   : > { %v2291_v36 = vld [vmem:[#allocation10 + $0x38] sm:$0xff]  ;;  %824 = vmatpush.bf16.msra.mxu1 %v2283_v35  ;;  %v2290_v39 = vld [vmem:[#allocation10 + $0x30] sm:$0xff]  ;;  %v2289_v42 = vld [vmem:[#allocation10 + $0x28] sm:$0xff] }
  0x62   : > { %v2518_v21 = vpop.eup %2517  ;;  %v2299_v37 = vld [vmem:[#allocation12 + $0x38] sm:$0xff]  ;;  %904 = vmatpush.bf16.msra.mxu2 %v2291_v36  ;;  %v2298_v40 = vld [vmem:[#allocation12 + $0x30] sm:$0xff]  ;;  %v2297_v43 = vld [vmem:[#allocation12 + $0x28] sm:$0xff]  ;;  %s613_s26 = scalar_lea.vmem %s3376_s20, %s1940_s16 }
  0x63   : > { %v709_v22 = vmul.f32 128.0, %v2518_v21  ;;  %vm713_vm0 = vweird.f32 %v2518_v21  ;;  %984 = vmatpush.bf16.msra.mxu3 %v2299_v37  ;;  %v2280_v44 = vld [vmem:[#allocation9 + $0x20] sm:$0xff]  ;;  %v2279_v47 = vld [vmem:[#allocation9 + $0x18] sm:$0xff]  ;;  %v2278_v50 = vld [vmem:[#allocation9 + $0x10] sm:$0xff] }
  0x64   : > { %686 = vmatpush.bf16.msra.mxu0 %v2273_v2  ;;  %v2288_v45 = vld [vmem:[#allocation10 + $0x20] sm:$0xff]  ;;  %v2287_v48 = vld [vmem:[#allocation10 + $0x18] sm:$0xff]  ;;  %v2286_v51 = vld [vmem:[#allocation10 + $0x10] sm:$0xff] }
  0x65   : > { %v710_v23 = vsub.f32 1.0, %v709_v22  ;;  %825 = vmatpush.bf16.msra.mxu1 %v2282_v38  ;;  %v2296_v46 = vld [vmem:[#allocation12 + $0x20] sm:$0xff]  ;;  %v2295_v49 = vld [vmem:[#allocation12 + $0x18] sm:$0xff]  ;;  %v2294_v52 = vld [vmem:[#allocation12 + $0x10] sm:$0xff] }
  0x66   : > { %905 = vmatpush.bf16.msra.mxu2 %v2290_v39  ;;  %v2277_v53 = vld [vmem:[#allocation9 + $0x8] sm:$0xff]  ;;  %v2276_v57 = vld [vmem:[#allocation9] sm:$0xff]  ;;  %v2508_v35 = vld [vmem:[#allocation7 + $0x3] ss:$0 sm:$0xff] }
  0x67   : > { %v711_v24 = vmul.f32 %v2518_v21, %v710_v23  ;;  %985 = vmatpush.bf16.msra.mxu3 %v2298_v40  ;;  %v2285_v54 = vld [vmem:[#allocation10 + $0x8] sm:$0xff]  ;;  %v2284_v58 = vld [vmem:[#allocation10] sm:$0xff] }
  0x68   : > { %687 = vmatpush.bf16.msra.mxu0 %v2272_v3  ;;  %v2293_v55 = vld [vmem:[#allocation12 + $0x8] sm:$0xff]  ;;  %v2292_v60 = vld [vmem:[#allocation12] sm:$0xff] }
  0x69   : > { %v712_v25 = vadd.f32 %v2518_v21, %v711_v24  ;;  %826 = vmatpush.bf16.msra.mxu1 %v2281_v41 }
  0x6a   : > { %906 = vmatpush.bf16.msra.mxu2 %v2289_v42 }
  0x6b   : > { %v3270_v26 = vsel %vm713_vm0, %v2518_v21, %v712_v25  ;;  %986 = vmatpush.bf16.msra.mxu3 %v2297_v43  ;;  %v2507_v21 = vld [vmem:[#allocation7 + $0x2] ss:$0 sm:$0xff] }
  0x6c   : > { %688 = vmatpush.bf16.msra.mxu0 %v2271_v4 }
  0x6d   : > { %827 = vmatpush.bf16.msra.mxu1 %v2280_v44  ;;  %v2993_v44 = vmov 0.0  }
  0x6e   : > { %907 = vmatpush.bf16.msra.mxu2 %v2288_v45 }
  0x6f   : > { %987 = vmatpush.bf16.msra.mxu3 %v2296_v46 }
  0x70   : > { %689 = vmatpush.bf16.msra.mxu0 %v2270_v5 }
  0x71   : > { %828 = vmatpush.bf16.msra.mxu1 %v2279_v47 }
  0x72   : > { %908 = vmatpush.bf16.msra.mxu2 %v2287_v48 }
  0x73   : > { %988 = vmatpush.bf16.msra.mxu3 %v2295_v49 }
  0x74   : > { %690 = vmatpush.bf16.msra.mxu0 %v2269_v6 }
  0x75   : > { %829 = vmatpush.bf16.msra.mxu1 %v2278_v50 }
  0x76   : > { %909 = vmatpush.bf16.msra.mxu2 %v2286_v51 }
  0x77   : > { %989 = vmatpush.bf16.msra.mxu3 %v2294_v52 }
  0x78   : > { %691 = vmatpush.bf16.msra.mxu0 %v2268_v7 }
  0x79   : > { %830 = vmatpush.bf16.msra.mxu1 %v2277_v53 }
  0x7a   : > { %910 = vmatpush.bf16.msra.mxu2 %v2285_v54 }
  0x7b   : > { %692 = vmatmul.bf16.vlgmr.msra.gmra.mxu0 %v617_v10  ;;  %990 = vmatpush.bf16.msra.mxu3 %v2293_v55 }
  0x7d   : > { %831 = vmatpush.bf16.msra.mxu1 %v2276_v57 }
  0x7e   : > { %911 = vmatpush.bf16.msra.mxu2 %v2284_v58 }
  0x7f   : > { %991 = vmatpush.bf16.msra.mxu3 %v2292_v60 }
  0xf8   : > { %v693_v12 = vpop.f32.mrf.mxu0 }
  0xf9   : > { %v694_v14 = vadd.f32 %v2505_v11, %v693_v12 }
  0xfb   : > { %v3264_v15 = vadd.f32 %v698_v13, %v694_v14  ;;  %v2506_v14 = vld [vmem:[#allocation7 + $0x1] ss:$0 sm:$0xff] }
  0xfd   : > { %704 = vadd.xlane.f32.xlu0 %v3264_v15 }
 0x100   : > { %v695_v16 = vpop.f32.mrf.mxu0 }
 0x101   : > { %v696_v18 = vadd.f32 %v2505_v11, %v695_v16 }
 0x103   : > { %v3267_v19 = vadd.f32 %v699_v17, %v696_v18 }
 0x105   : > { %706 = vadd.xlane.f32.xlu0 %v3267_v19 }
 0x170   : > { %v705_v27 = vpop.xlane.xlu0 %704 }
 0x171   : > { %v715_v28 = vmul.f32 %v3270_v26, %v705_v27 }
 0x173   : > { %v3274_v29 = vsub.f32 %v3264_v15, %v715_v28  ;;  %v999_v28 = vlaneseq }
 0x175   : > { %v719_v30 = vmul.f32 %v3274_v29, %v3274_v29 }
 0x177   : > { %721 = vadd.xlane.f32.xlu1 %v719_v30 }
 0x178   : > { %v707_v31 = vpop.xlane.xlu0 %706 }
 0x179   : > { %v716_v32 = vmul.f32 %v3270_v26, %v707_v31  ;;  %v1000_v31 = vand.u32 127, %v999_v28 }
 0x17b   : > { %v3280_v33 = vsub.f32 %v3267_v19, %v716_v32  ;;  %v2510_v32 = vld [vmem:[#allocation7 + $0x5] ss:$0 sm:$0xff]  ;;  %vm1002_vm7 = vcmp.lt.s32.totalorder %v1000_v31, 64  ;;  %vm1052_vm8 = vcmp.ge.s32.totalorder %v1000_v31, 64  ;;  %v2307_v31 = vld [vmem:[#allocation13 + $0x38] sm:$0xff] }
 0x17c   : > { %v2069_v45 = vsel %vm1002_vm7, 1.0, %v2993_v44  ;;  %v2070_v46 = vsel %vm1052_vm8, 1.0, %v2993_v44  ;;  %1203 = vmatpush.bf16.msrb.mxu0 %v2307_v31  ;;  %v2317_v31 = vld [vmem:[#allocation15 + $0x44] sm:$0xf0] }
 0x17d   : > { %v720_v34 = vmul.f32 %v3280_v33, %v3280_v33 }
 0x17f   : > { %723 = vadd.xlane.f32.xlu1 %v720_v34  ;;  %v2509_v34 = vld [vmem:[#allocation7 + $0x4] ss:$0 sm:$0xff] }
 0x1ea   : > { %v722_v56 = vpop.xlane.xlu1 %721 }
 0x1eb   : > { %v725_v59 = vmul.f32 %v722_v56, %v3270_v26 }
 0x1ed   : > { %v727_v61 = vadd.f32 1e-05, %v725_v59 }
 0x1ef   : > { %2519 = vrsqrt.f32 %v727_v61  ;;  %vm735_vm2 = vweird.f32 %v727_v61 }
 0x1f2   : > { %v724_v62 = vpop.xlane.xlu1 %723 }
 0x1f3   : > { %v726_v63 = vmul.f32 %v724_v62, %v3270_v26 }
 0x1f5   : > { %v2520_v0 = vpop.eup %2519  ;;  %v728_v1 = vadd.f32 1e-05, %v726_v63 }
 0x1f6   : > { %v730_v2 = vmul.f32 %v2520_v0, %v727_v61  ;;  %vm736_vm1 = vweird.f32 %v2520_v0 }
 0x1f7   : > { %2521 = vrsqrt.f32 %v728_v1  ;;  %vm737_vm3 = vmor %vm735_vm2, %vm736_vm1  ;;  %vm745_vm5 = vweird.f32 %v728_v1 }
 0x1f8   : > { %v731_v3 = vmul.f32 %v2520_v0, %v730_v2 }
 0x1fa   : > { %v732_v4 = vmul.f32 0.5, %v731_v3 }
 0x1fc   : > { %v733_v5 = vsub.f32 1.5, %v732_v4 }
 0x1fd   : > { %v2522_v6 = vpop.eup %2521 }
 0x1fe   : > { %v734_v7 = vmul.f32 %v2520_v0, %v733_v5  ;;  %v740_v8 = vmul.f32 %v2522_v6, %v728_v1  ;;  %vm746_vm4 = vweird.f32 %v2522_v6 }
 0x1ff   : > { %vm747_vm6 = vmor %vm745_vm5, %vm746_vm4 }
 0x200   : > { %v741_v9 = vmul.f32 %v2522_v6, %v740_v8  ;;  %v738_v10 = vsel %vm737_vm3, %v2520_v0, %v734_v7 }
 0x201   : > { %v749_v13 = vmul.f32 %v738_v10, %v3274_v29 }
 0x202   : > { %v742_v11 = vmul.f32 0.5, %v741_v9 }
 0x203   : > { %v752_v20 = vmul.f32 %v2506_v14, %v749_v13 }
 0x204   : > { %v743_v12 = vsub.f32 1.5, %v742_v11 }
 0x205   : > { %v755_v23 = vadd.f32 %v2507_v21, %v752_v20 }
 0x206   : > { %v744_v16 = vmul.f32 %v2522_v6, %v743_v12 }
 0x208   : > { %v748_v17 = vsel %vm747_vm6, %v2522_v6, %v744_v16 }
 0x209   : > { %v750_v18 = vmul.f32 %v748_v17, %v3280_v33 }
 0x20b   : > { %v753_v22 = vmul.f32 %v2506_v14, %v750_v18 }
 0x20d   : > { %v756_v24 = vadd.f32 %v2507_v21, %v753_v22 }
 0x20f   : > { %v757_v25 = vpack.c.bf16 %v756_v24, %v755_v23 }
 0x211   : > { %832 = vmatmul.bf16.vlgmr.msra.gmra.mxu1 %v757_v25  ;;  %912 = vmatmul.bf16.vlgmr.msra.gmra.mxu2 %v757_v25 }
 0x212   : > { %992 = vmatmul.bf16.vlgmr.msra.gmra.mxu3 %v757_v25 }
 0x28e   : > { %v833_v27 = vpop.f32.mrf.mxu1 }
 0x28f   : > { %v834_v43 = vadd.f32 %v2508_v35, %v833_v27 }
 0x291   : > { %v1006_v56 = vmul.f32 %v2069_v45, %v834_v43  ;;  %v1057_v57 = vmul.f32 %v2070_v46, %v834_v43 }
 0x294   : > { %v913_v30 = vpop.f32.mrf.mxu2 }
 0x295   : > { %v993_v29 = vpop.f32.mrf.mxu3  ;;  %v914_v38 = vadd.f32 %v2509_v34, %v913_v30 }
 0x296   : > { %v835_v36 = vpop.f32.mrf.mxu1  ;;  %v994_v33 = vadd.f32 %v2510_v32, %v993_v29 }
 0x297   : > { %v836_v41 = vadd.f32 %v2508_v35, %v835_v36  ;;  %v2304_v35 = vld [vmem:[#allocation13 + $0x20] sm:$0xff] }
 0x298   : > { %v1009_v48 = vmul.f32 %v2069_v45, %v994_v33  ;;  %v1060_v49 = vmul.f32 %v2070_v46, %v994_v33  ;;  %v2303_v33 = vld [vmem:[#allocation13 + $0x18] sm:$0xff] }
 0x299   : > { %v1007_v52 = vmul.f32 %v2069_v45, %v836_v41  ;;  %v1058_v53 = vmul.f32 %v2070_v46, %v836_v41 }
 0x29b   : > { %v1008_v58 = vpack.c.bf16 %v1007_v52, %v1006_v56  ;;  %v1059_v59 = vpack.c.bf16 %v1058_v53, %v1057_v57  ;;  %v2300_v52 = vld [vmem:[#allocation13] sm:$0xff] }
 0x29c   : > { %v915_v37 = vpop.f32.mrf.mxu2 }
 0x29d   : > { %v916_v39 = vadd.f32 %v2509_v34, %v915_v37  ;;  %v995_v40 = vpop.f32.mrf.mxu3  ;;  %v2305_v34 = vld [vmem:[#allocation13 + $0x28] sm:$0xff] }
 0x29e   : > { %v996_v42 = vadd.f32 %v2510_v32, %v995_v40  ;;  %v2306_v32 = vld [vmem:[#allocation13 + $0x30] sm:$0xff] }
 0x29f   : > { %v998_v47 = vpack.c.bf16 %v916_v39, %v914_v38  ;;  %1204 = vmatpush.bf16.msrb.mxu0 %v2306_v32  ;;  %v2316_v32 = vld [vmem:[#allocation15 + $0x44] sm:$0xf] }
 0x2a0   : > { %v1010_v50 = vmul.f32 %v2069_v45, %v996_v42  ;;  %v1061_v51 = vmul.f32 %v2070_v46, %v996_v42 }
 0x2a1   : > { %1019 = vmatpush.bf16.xpose.msrb.mxu2 %v998_v47  ;;  %1070 = vmatpush.bf16.xpose.msrb.mxu3 %v998_v47 }
 0x2a2   : > { %v1011_v54 = vpack.c.bf16 %v1010_v50, %v1009_v48  ;;  %v1062_v55 = vpack.c.bf16 %v1061_v51, %v1060_v49  ;;  %v2302_v50 = vld [vmem:[#allocation13 + $0x10] sm:$0xff]  ;;  %v2301_v51 = vld [vmem:[#allocation13 + $0x8] sm:$0xff] }
 0x2a3   : > { %1205 = vmatpush.bf16.msrb.mxu0 %v2305_v34 }
 0x2a7   : > { %1206 = vmatpush.bf16.msrb.mxu0 %v2304_v35  ;;  %v2141_v35 = vld [vmem:[#allocation15 + $0x48] sm:$0xf0] }
 0x2a8   : > { %1020 = vmatmul.bf16.vlgmr.msrb.gmra.mxu2 %v1008_v58  ;;  %1071 = vmatmul.bf16.vlgmr.msrb.gmra.mxu3 %v1059_v59 }
 0x2a9   : > { %1112 = vmatpush.bf16.msra.mxu2 %v1062_v55  ;;  %1129 = vmatpush.bf16.msra.mxu3 %v1011_v54 }
 0x2ab   : > { %1207 = vmatpush.bf16.msrb.mxu0 %v2303_v33  ;;  %v2131_v33 = vld [vmem:[#allocation15 + $0x30] sm:$0xf] }
 0x2af   : > { %1208 = vmatpush.bf16.msrb.mxu0 %v2302_v50  ;;  %v2310_v50 = vld [vmem:[#allocation15 + $0x14] sm:$0xf] }
 0x2b3   : > { %1209 = vmatpush.bf16.msrb.mxu0 %v2301_v51 }
 0x2b7   : > { %1210 = vmatpush.bf16.msrb.mxu0 %v2300_v52  ;;  %v2117_v52 = vld [vmem:[#allocation15 + $0x18] sm:$0xf0] }
 0x32b   : > { %v1021_v60 = vpop.f32.mrf.mxu2  ;;  %v1072_v61 = vpop.f32.mrf.mxu3 }
 0x32c   : > { %v1026_v62 = vmul.f32 0.125, %v1021_v60  ;;  %v1077_v63 = vmul.f32 0.125, %v1072_v61  ;;  %v2511_v60 = vld [vmem:[#allocation7 + $0x6] ss:$0 sm:$0xff] }
 0x32e   : > { %v1079_v0 = vsel %vm1028_vm9, %v1077_v63, -inf  ;;  %v1029_v1 = vsel %vm1028_vm9, %v1026_v62, -inf }
 0x32f   : > { %1080 = vmax.xlane.f32.xlu0 %v1079_v0  ;;  %1030 = vmax.xlane.f32.xlu2 %v1029_v1 }
 0x333   : > { %v1023_v2 = vpop.f32.mrf.mxu2  ;;  %v1074_v3 = vpop.f32.mrf.mxu3 }
 0x334   : > { %v1027_v4 = vmul.f32 0.125, %v1023_v2  ;;  %v1078_v5 = vmul.f32 0.125, %v1074_v3 }
 0x336   : > { %v1082_v6 = vsel %vm1028_vm9, %v1078_v5, -inf  ;;  %v1032_v7 = vsel %vm1028_vm9, %v1027_v4, -inf }
 0x337   : > { %1083 = vmax.xlane.f32.xlu1 %v1082_v6  ;;  %1033 = vmax.xlane.f32.xlu2 %v1032_v7 }
 0x3a2   : > { %v1081_v8 = vpop.xlane.xlu0 %1080  ;;  %v1031_v9 = vpop.xlane.xlu2 %1030 }
 0x3a3   : > { %v1085_v10 = vsub.f32 %v1077_v63, %v1081_v8  ;;  %v1035_v11 = vsub.f32 %v1026_v62, %v1031_v9  ;;  %v2163_v9 = vld [vmem:[#allocation15 + $0x70] sm:$0xf] }
 0x3a5   : > { %v1087_v12 = vmul.f32 1.442695, %v1085_v10  ;;  %v1037_v13 = vmul.f32 1.442695, %v1035_v11  ;;  %v2323_v10 = vld [vmem:[#allocation15 + $0x74] sm:$0xf0] }
 0x3a6   : > { %v2322_v11 = vld [vmem:[#allocation15 + $0x74] sm:$0xf] }
 0x3a7   : > { %2523 = vpow2.f32 %v1087_v12  ;;  %v2164_v12 = vor.u32 %v2323_v10, %v2163_v9 }
 0x3a8   : > { %2525 = vpow2.f32 %v1037_v13  ;;  %v2165_v13 = vld [vmem:[#allocation15 + $0x78] sm:$0xf0] }
 0x3a9   : > { %1370 = vmatpush.bf16.msrb.mxu1 %v2164_v12 }
 0x3aa   : > { %v1084_v14 = vpop.xlane.xlu1 %1083  ;;  %v1034_v16 = vpop.xlane.xlu2 %1033 }
 0x3ab   : > { %v1086_v17 = vsub.f32 %v1078_v5, %v1084_v14  ;;  %v1036_v18 = vsub.f32 %v1027_v4, %v1034_v16  ;;  %v2168_v14 = vor.u32 %v2322_v11, %v2165_v13  ;;  %v2155_v16 = vld [vmem:[#allocation15 + $0x60] sm:$0xf] }
 0x3ad   : > { %v2524_v20 = vpop.eup %2523  ;;  %v1089_v21 = vmul.f32 1.442695, %v1086_v17  ;;  %v1039_v22 = vmul.f32 1.442695, %v1036_v18  ;;  %1384 = vmatpush.bf16.msrb.mxu2 %v2168_v14  ;;  %v2321_v17 = vld [vmem:[#allocation15 + $0x64] sm:$0xf0] }
 0x3ae   : > { %v2526_v23 = vpop.eup %2525  ;;  %v1091_v24 = vsel %vm1028_vm9, %v2524_v20, 0.0  ;;  %v2320_v18 = vld [vmem:[#allocation15 + $0x64] sm:$0xf] }
 0x3af   : > { %2527 = vpow2.f32 %v1089_v21  ;;  %1092 = vadd.xlane.f32.xlu1 %v1091_v24  ;;  %v1041_v25 = vsel %vm1028_vm9, %v2526_v23, 0.0  ;;  %v2157_v21 = vld [vmem:[#allocation15 + $0x68] sm:$0xf0]  ;;  %v2319_v24 = vld [vmem:[#allocation15 + $0x54] sm:$0xf0] }
 0x3b0   : > { %2529 = vpow2.f32 %v1039_v22  ;;  %1042 = vadd.xlane.f32.xlu2 %v1041_v25  ;;  %v2160_v22 = vor.u32 %v2320_v18, %v2157_v21  ;;  %v2318_v25 = vld [vmem:[#allocation15 + $0x54] sm:$0xf] }
 0x3b1   : > { %v2512_v18 = vld [vmem:[#allocation7 + $0x7] ss:$0 sm:$0xff] }
 0x3b2   : > { %1385 = vmatpush.bf16.msrb.mxu2 %v2160_v22 }
 0x3b5   : > { %v2528_v27 = vpop.eup %2527 }
 0x3b6   : > { %v2530_v28 = vpop.eup %2529  ;;  %v1094_v30 = vsel %vm1028_vm9, %v2528_v27, 0.0 }
 0x3b7   : > { %v1044_v29 = vsel %vm1028_vm9, %v2530_v28, 0.0 }
 0x3b8   : > { %1095 = vadd.xlane.f32.xlu2 %v1094_v30  ;;  %1045 = vadd.xlane.f32.xlu0 %v1044_v29  ;;  %v2139_v29 = vld [vmem:[#allocation15 + $0x40] sm:$0xf] }
 0x3b9   : > { %v2140_v34 = vor.u32 %v2317_v31, %v2139_v29  ;;  %v2331_v29 = vld [vmem:[#allocation18 + $0x38] sm:$0xff]  ;;  %v2330_v31 = vld [vmem:[#allocation18 + $0x30] sm:$0xff] }
 0x3ba   : > { %1566 = vmatpush.bf16.msrb.mxu3 %v2331_v29 }
 0x3be   : > { %1567 = vmatpush.bf16.msrb.mxu3 %v2330_v31 }
 0x422   : > { %v1093_v37 = vpop.xlane.xlu1 %1092 }
 0x423   : > { %v1043_v36 = vpop.xlane.xlu2 %1042 }
 0x424   : > { %2531 = vrcp.f32 %v1043_v36  ;;  %v2144_v36 = vor.u32 %v2316_v32, %v2141_v35  ;;  %v2329_v32 = vld [vmem:[#allocation18 + $0x28] sm:$0xff]  ;;  %v2328_v35 = vld [vmem:[#allocation18 + $0x20] sm:$0xff] }
 0x425   : > { %2533 = vrcp.f32 %v1093_v37  ;;  %v2315_v37 = vld [vmem:[#allocation15 + $0x34] sm:$0xf0]  ;;  %1568 = vmatpush.bf16.msrb.mxu3 %v2329_v32 }
 0x429   : > { %1569 = vmatpush.bf16.msrb.mxu3 %v2328_v35 }
 0x42a   : > { %v2532_v40 = vpop.eup %2531 }
 0x42b   : > { %v1046_v38 = vpop.xlane.xlu0 %1045  ;;  %v1096_v39 = vpop.xlane.xlu2 %1095  ;;  %v1049_v44 = vmul.f32 %v2532_v40, %v2526_v23  ;;  %v2147_v23 = vld [vmem:[#allocation15 + $0x50] sm:$0xf]  ;;  %v2133_v40 = vld [vmem:[#allocation15 + $0x38] sm:$0xf0] }
 0x42c   : > { %2535 = vrcp.f32 %v1046_v38  ;;  %v2534_v41 = vpop.eup %2533  ;;  %v2314_v38 = vld [vmem:[#allocation15 + $0x34] sm:$0xf] }
 0x42d   : > { %2537 = vrcp.f32 %v1096_v39  ;;  %v1099_v46 = vmul.f32 %v2534_v41, %v2524_v20  ;;  %v2156_v20 = vor.u32 %v2321_v17, %v2155_v16  ;;  %v2132_v39 = vor.u32 %v2315_v37, %v2131_v33  ;;  %v2336_v33 = vld [vmem:[#allocation18 + $0x60] sm:$0xff]  ;;  %v2326_v37 = vld [vmem:[#allocation18 + $0x10] sm:$0xff] }
 0x42e   : > { %v2136_v41 = vor.u32 %v2314_v38, %v2133_v40  ;;  %v2335_v38 = vld [vmem:[#allocation18 + $0x58] sm:$0xff]  ;;  %v2334_v40 = vld [vmem:[#allocation18 + $0x50] sm:$0xff] }
 0x42f   : > { %1371 = vmatpush.bf16.msrb.mxu1 %v2156_v20 }
 0x432   : > { %v2536_v42 = vpop.eup %2535 }
 0x433   : > { %v2538_v43 = vpop.eup %2537  ;;  %v1050_v45 = vmul.f32 %v2536_v42, %v2530_v28  ;;  %v2149_v28 = vld [vmem:[#allocation15 + $0x58] sm:$0xf0]  ;;  %v2123_v42 = vld [vmem:[#allocation15 + $0x20] sm:$0xf] }
 0x434   : > { %v1100_v47 = vmul.f32 %v2538_v43, %v2528_v27  ;;  %v2148_v27 = vor.u32 %v2319_v24, %v2147_v23  ;;  %v2152_v30 = vor.u32 %v2318_v25, %v2149_v28  ;;  %v2313_v43 = vld [vmem:[#allocation15 + $0x24] sm:$0xf0]  ;;  %v2513_v24 = vld [vmem:[#allocation7 + $0x8] ss:$0 sm:$0xff] }
 0x435   : > { %v1051_v48 = vpack.c.bf16 %v1050_v45, %v1049_v44  ;;  %v2312_v44 = vld [vmem:[#allocation15 + $0x24] sm:$0xf]  ;;  %v2124_v45 = vor.u32 %v2313_v43, %v2123_v42 }
 0x436   : > { %v1101_v49 = vpack.c.bf16 %v1100_v47, %v1099_v46  ;;  %1372 = vmatpush.bf16.msrb.mxu1 %v2148_v27  ;;  %1386 = vmatpush.bf16.msrb.mxu2 %v2152_v30  ;;  %v2125_v46 = vld [vmem:[#allocation15 + $0x28] sm:$0xf0]  ;;  %v2324_v42 = vld [vmem:[#allocation18] sm:$0xff] }
 0x437   : > { %2072 = vmatmul.msk.bf16.vlgmr.msra.gmra.mxu3 %vm1028_vm9, %v1051_v48  ;;  %v2128_v47 = vor.u32 %v2312_v44, %v2125_v46  ;;  %v2115_v48 = vld [vmem:[#allocation15 + $0x10] sm:$0xf] }
 0x438   : > { %2071 = vmatmul.msk.bf16.vlgmr.msra.gmra.mxu2 %vm1028_vm9, %v1101_v49  ;;  %v2311_v49 = vld [vmem:[#allocation15 + $0x14] sm:$0xf0]  ;;  %v2333_v44 = vld [vmem:[#allocation18 + $0x48] sm:$0xff] }
 0x439   : > { %v2116_v51 = vor.u32 %v2311_v49, %v2115_v48 }
 0x43a   : > { %1373 = vmatpush.bf16.msrb.mxu1 %v2140_v34  ;;  %1387 = vmatpush.bf16.msrb.mxu2 %v2144_v36  ;;  %v2338_v34 = vld [vmem:[#allocation18 + $0x70] sm:$0xff]  ;;  %v2327_v36 = vld [vmem:[#allocation18 + $0x18] sm:$0xff] }
 0x43b   : > { %1570 = vmatpush.bf16.msrb.mxu3 %v2327_v36 }
 0x43e   : > { %1374 = vmatpush.bf16.msrb.mxu1 %v2132_v39  ;;  %1388 = vmatpush.bf16.msrb.mxu2 %v2136_v41  ;;  %v2325_v39 = vld [vmem:[#allocation18 + $0x8] sm:$0xff]  ;;  %v1284_v41 = vld [vmem:[#allocation16] sm:$0x3] }
 0x43f   : > { %1571 = vmatpush.bf16.msrb.mxu3 %v2326_v37  ;;  %v1286_v43 = vperm.slane %v1284_v41, 0  ;;  %v1287_v49 = vperm.slane %v1284_v41, 1 }
 0x442   : > { %1375 = vmatpush.bf16.msrb.mxu1 %v2124_v45  ;;  %1389 = vmatpush.bf16.msrb.mxu2 %v2128_v47  ;;  %v2332_v47 = vld [vmem:[#allocation18 + $0x40] sm:$0xff] }
 0x443   : > { %1572 = vmatpush.bf16.msrb.mxu3 %v2325_v39 }
 0x446   : > { %1376 = vmatpush.bf16.msrb.mxu1 %v2116_v51 }
 0x447   : > { %1573 = vmatpush.bf16.msrb.mxu3 %v2324_v42 }
 0x4ba   : > { %v1131_v53 = vpop.f32.mrf.mxu3 }
 0x4bb   : > { %v1114_v54 = vpop.f32.mrf.mxu2 }
 0x4bc   : > { %v1132_v57 = vadd.f32 %v1131_v53, %v1114_v54  ;;  %v2120_v53 = vor.u32 %v2310_v50, %v2117_v52  ;;  %v2107_v54 = vld [vmem:[#allocation15] sm:$0xf] }
 0x4be   : > { %1390 = vmatpush.bf16.msrb.mxu2 %v2120_v53 }
 0x4c2   : > { %v1133_v55 = vpop.f32.mrf.mxu3 }
 0x4c3   : > { %v1116_v56 = vpop.f32.mrf.mxu2 }
 0x4c4   : > { %v1134_v58 = vadd.f32 %v1133_v55, %v1116_v56  ;;  %v2309_v55 = vld [vmem:[#allocation15 + $0x4] sm:$0xf0]  ;;  %v2308_v56 = vld [vmem:[#allocation15 + $0x4] sm:$0xf] }
 0x4c6   : > { %v1136_v59 = vpack.c.bf16 %v1134_v58, %v1132_v57  ;;  %v2108_v58 = vor.u32 %v2309_v55, %v2107_v54 }
 0x4c8   : > { %1211 = vmatmul.bf16.vlgmr.msrb.gmra.mxu0 %v1136_v59  ;;  %v2109_v59 = vld [vmem:[#allocation15 + $0x8] sm:$0xf0]  ;;  %1377 = vmatpush.bf16.msrb.mxu1 %v2108_v58 }
 0x545   : > { %v1212_v61 = vpop.f32.mrf.mxu0 }
 0x546   : > { %v1213_v62 = vadd.f32 %v2511_v60, %v1212_v61  ;;  %v2112_v61 = vor.u32 %v2308_v56, %v2109_v59 }
 0x548   : > { %v3299_v63 = vadd.f32 %v1213_v62, %v3264_v15  ;;  %1391 = vmatpush.bf16.msrb.mxu2 %v2112_v61 }
 0x54a   : > { %1221 = vadd.xlane.f32.xlu0 %v3299_v63 }
 0x54d   : > { %v1214_v0 = vpop.f32.mrf.mxu0 }
 0x54e   : > { %v1215_v1 = vadd.f32 %v2511_v60, %v1214_v0 }
 0x550   : > { %v3303_v2 = vadd.f32 %v1215_v1, %v3267_v19 }
 0x552   : > { %1223 = vadd.xlane.f32.xlu1 %v3303_v2 }
 0x5bd   : > { %v1222_v3 = vpop.xlane.xlu0 %1221 }
 0x5be   : > { %v1225_v4 = vmul.f32 %v1222_v3, %v3270_v26 }
 0x5c0   : > { %v3308_v5 = vsub.f32 %v3299_v63, %v1225_v4 }
 0x5c2   : > { %v1229_v6 = vmul.f32 %v3308_v5, %v3308_v5 }
 0x5c4   : > { %1231 = vadd.xlane.f32.xlu2 %v1229_v6 }
 0x5c5   : > { %v1224_v15 = vpop.xlane.xlu1 %1223 }
 0x5c6   : > { %v1226_v7 = vmul.f32 %v1224_v15, %v3270_v26 }
 0x5c8   : > { %v3314_v8 = vsub.f32 %v3303_v2, %v1226_v7 }
 0x5ca   : > { %v1230_v19 = vmul.f32 %v3314_v8, %v3314_v8 }
 0x5cc   : > { %1233 = vadd.xlane.f32.xlu0 %v1230_v19 }
 0x637   : > { %v1232_v57 = vpop.xlane.xlu2 %1231 }
 0x638   : > { %v1235_v60 = vmul.f32 %v1232_v57, %v3270_v26 }
 0x63a   : > { %v1237_v62 = vadd.f32 1e-05, %v1235_v60 }
 0x63c   : > { %2539 = vrsqrt.f32 %v1237_v62  ;;  %vm1245_vm11 = vweird.f32 %v1237_v62 }
 0x63f   : > { %v1234_v0 = vpop.xlane.xlu0 %1233 }
 0x640   : > { %v1236_v1 = vmul.f32 %v1234_v0, %v3270_v26 }
 0x642   : > { %v2540_v3 = vpop.eup %2539  ;;  %v1238_v4 = vadd.f32 1e-05, %v1236_v1 }
 0x643   : > { %v1240_v6 = vmul.f32 %v2540_v3, %v1237_v62  ;;  %vm1246_vm10 = vweird.f32 %v2540_v3 }
 0x644   : > { %2541 = vrsqrt.f32 %v1238_v4  ;;  %vm1247_vm12 = vmor %vm1245_vm11, %vm1246_vm10  ;;  %vm1255_vm14 = vweird.f32 %v1238_v4 }
 0x645   : > { %v1241_v15 = vmul.f32 %v2540_v3, %v1240_v6 }
 0x647   : > { %v1242_v7 = vmul.f32 0.5, %v1241_v15 }
 0x649   : > { %v1243_v19 = vsub.f32 1.5, %v1242_v7 }
 0x64a   : > { %v2542_v9 = vpop.eup %2541 }
 0x64b   : > { %v1244_v10 = vmul.f32 %v2540_v3, %v1243_v19  ;;  %v1250_v11 = vmul.f32 %v2542_v9, %v1238_v4  ;;  %vm1256_vm13 = vweird.f32 %v2542_v9 }
 0x64c   : > { %vm1257_vm15 = vmor %vm1255_vm14, %vm1256_vm13 }
 0x64d   : > { %v1251_v12 = vmul.f32 %v2542_v9, %v1250_v11  ;;  %v1248_v13 = vsel %vm1247_vm12, %v2540_v3, %v1244_v10 }
 0x64e   : > { %v1259_v17 = vmul.f32 %v1248_v13, %v3308_v5  ;;  %v2339_v5 = vld [vmem:[#allocation18 + $0x78] sm:$0xff] }
 0x64f   : > { %v1252_v14 = vmul.f32 0.5, %v1251_v12  ;;  %1580 = vmatpush.bf16.msra.mxu0 %v2339_v5 }
 0x650   : > { %v1262_v23 = vmul.f32 %v2512_v18, %v1259_v17 }
 0x651   : > { %v1253_v16 = vsub.f32 1.5, %v1252_v14 }
 0x652   : > { %v1265_v27 = vadd.f32 %v2513_v24, %v1262_v23 }
 0x653   : > { %v1254_v20 = vmul.f32 %v2542_v9, %v1253_v16  ;;  %1581 = vmatpush.bf16.msra.mxu0 %v2338_v34  ;;  %v2514_v34 = vld [vmem:[#allocation7 + $0x9] ss:$0 sm:$0xff] }
 0x655   : > { %v1258_v21 = vsel %vm1257_vm15, %v2542_v9, %v1254_v20 }
 0x656   : > { %v1260_v22 = vmul.f32 %v1258_v21, %v3314_v8  ;;  %v2337_v8 = vld [vmem:[#allocation18 + $0x68] sm:$0xff] }
 0x657   : > { %1582 = vmatpush.bf16.msra.mxu0 %v2337_v8 }
 0x658   : > { %v1263_v25 = vmul.f32 %v2512_v18, %v1260_v22 }
 0x65a   : > { %v1266_v28 = vadd.f32 %v2513_v24, %v1263_v25 }
 0x65b   : > { %1583 = vmatpush.bf16.msra.mxu0 %v2336_v33 }
 0x65c   : > { %v1267_v30 = vpack.c.bf16 %v1266_v28, %v1265_v27 }
 0x65e   : > { %1378 = vmatmul.bf16.vlgmr.msrb.gmra.mxu1 %v1267_v30  ;;  %1392 = vmatmul.bf16.vlgmr.msrb.gmra.mxu2 %v1267_v30 }
 0x65f   : > { %1584 = vmatpush.bf16.msra.mxu0 %v2335_v38 }
 0x663   : > { %1585 = vmatpush.bf16.msra.mxu0 %v2334_v40 }
 0x667   : > { %1586 = vmatpush.bf16.msra.mxu0 %v2333_v44 }
 0x66b   : > { %1587 = vmatpush.bf16.msra.mxu0 %v2332_v47 }
 0x6db   : > { %v1379_v45 = vpop.f32.mrf.mxu1 }
 0x6dc   : > { %v1380_v46 = vadd.f32 %v1379_v45, %v1286_v43 }
 0x6de   : > { %v1402_v48 = vmul.f32 0.044715, %v1380_v46  ;;  %v1398_v17 = vmul.f32 0.5, %v1380_v46 }
 0x6e0   : > { %v1406_v50 = vmul.f32 %v1402_v48, %v1380_v46 }
 0x6e1   : > { %v1393_v51 = vpop.f32.mrf.mxu2 }
 0x6e2   : > { %v1410_v52 = vmul.f32 %v1406_v50, %v1380_v46  ;;  %v1394_v53 = vadd.f32 %v1393_v51, %v1287_v49  ;;  %v2346_v51 = vld [vmem:[#allocation19 + $0x30] sm:$0xff] }
 0x6e3   : > { %v1381_v54 = vpop.f32.mrf.mxu1 }
 0x6e4   : > { %v1414_v55 = vadd.f32 %v1410_v52, %v1380_v46  ;;  %v1403_v56 = vmul.f32 0.044715, %v1394_v53  ;;  %v1382_v57 = vadd.f32 %v1381_v54, %v1286_v43  ;;  %v1399_v28 = vmul.f32 0.5, %v1394_v53  ;;  %v2345_v52 = vld [vmem:[#allocation19 + $0x28] sm:$0xff]  ;;  %v2344_v54 = vld [vmem:[#allocation19 + $0x20] sm:$0xff] }
 0x6e6   : > { %v1407_v58 = vmul.f32 %v1403_v56, %v1394_v53  ;;  %v1404_v59 = vmul.f32 0.044715, %v1382_v57  ;;  %v1418_v60 = vmul.f32 0.7978846, %v1414_v55  ;;  %v1400_v18 = vmul.f32 0.5, %v1382_v57  ;;  %v2343_v56 = vld [vmem:[#allocation19 + $0x18] sm:$0xff] }
 0x6e8   : > { %v1411_v61 = vmul.f32 %v1407_v58, %v1394_v53  ;;  %v1408_v62 = vmul.f32 %v1404_v59, %v1382_v57  ;;  %2543 = vtanh.f32 %v1418_v60  ;;  %v2342_v58 = vld [vmem:[#allocation19 + $0x10] sm:$0xff] }
 0x6e9   : > { %v1395_v0 = vpop.f32.mrf.mxu2 }
 0x6ea   : > { %v1415_v1 = vadd.f32 %v1411_v61, %v1394_v53  ;;  %v1412_v3 = vmul.f32 %v1408_v62, %v1382_v57  ;;  %v1396_v4 = vadd.f32 %v1395_v0, %v1287_v49  ;;  %v2341_v0 = vld [vmem:[#allocation19 + $0x8] sm:$0xff] }
 0x6ec   : > { %v1416_v6 = vadd.f32 %v1412_v3, %v1382_v57  ;;  %v1405_v15 = vmul.f32 0.044715, %v1396_v4  ;;  %v1419_v7 = vmul.f32 0.7978846, %v1415_v1  ;;  %v1401_v30 = vmul.f32 0.5, %v1396_v4 }
 0x6ee   : > { %v1420_v19 = vmul.f32 0.7978846, %v1416_v6  ;;  %v1409_v9 = vmul.f32 %v1405_v15, %v1396_v4  ;;  %v2544_v11 = vpop.eup %2543 }
 0x6ef   : > { %v1426_v14 = vadd.f32 1.0, %v2544_v11 }
 0x6f0   : > { %v1413_v10 = vmul.f32 %v1409_v9, %v1396_v4  ;;  %2545 = vtanh.f32 %v1420_v19 }
 0x6f1   : > { %2547 = vtanh.f32 %v1419_v7  ;;  %v1430_v22 = vmul.f32 %v1426_v14, %v1398_v17 }
 0x6f2   : > { %v1417_v12 = vadd.f32 %v1413_v10, %v1396_v4  ;;  %v2340_v4 = vld [vmem:[#allocation19] sm:$0xff] }
 0x6f4   : > { %v1421_v13 = vmul.f32 0.7978846, %v1417_v12 }
 0x6f6   : > { %v2546_v16 = vpop.eup %2545  ;;  %2549 = vtanh.f32 %v1421_v13  ;;  %v2515_v13 = vld [vmem:[#allocation7 + $0xa] ss:$0 sm:$0xff] }
 0x6f7   : > { %v1428_v20 = vadd.f32 1.0, %v2546_v16  ;;  %v2548_v21 = vpop.eup %2547 }
 0x6f8   : > { %v1427_v25 = vadd.f32 1.0, %v2548_v21 }
 0x6f9   : > { %v1432_v23 = vmul.f32 %v1428_v20, %v1400_v18  ;;  %v2516_v20 = vld [vmem:[#allocation7 + $0xb] ss:$0 sm:$0xff] }
 0x6fa   : > { %v1431_v31 = vmul.f32 %v1427_v25, %v1399_v28 }
 0x6fb   : > { %v1434_v24 = vpack.c.bf16 %v1432_v23, %v1430_v22 }
 0x6fc   : > { %v2550_v27 = vpop.eup %2549 }
 0x6fd   : > { %1574 = vmatmul.bf16.vlgmr.msrb.gmra.mxu3 %v1434_v24  ;;  %v1429_v29 = vadd.f32 1.0, %v2550_v27 }
 0x6ff   : > { %v1433_v5 = vmul.f32 %v1429_v29, %v1401_v30 }
 0x701   : > { %v1435_v32 = vpack.c.bf16 %v1433_v5, %v1431_v31 }
 0x703   : > { %1588 = vmatmul.bf16.vlgmr.msra.gmra.mxu0 %v1435_v32 }
 0x780   : > { %v1575_v35 = vpop.f32.mrf.mxu3  ;;  %v1589_v8 = vpop.f32.mrf.mxu0 }
 0x781   : > { %v1576_v36 = vadd.f32 %v2514_v34, %v1575_v35 }
 0x783   : > { %v1590_v33 = vadd.f32 %v1589_v8, %v1576_v36 }
 0x785   : > { %v1594_v37 = vadd.f32 %v1590_v33, %v3299_v63  ;;  %v2347_v63 = vld [vmem:[#allocation19 + $0x38] sm:$0xff] }
 0x786   : > { %1725 = vmatpush.bf16.msra.mxu1 %v2347_v63 }
 0x787   : > { %1598 = vadd.xlane.f32.xlu1 %v1594_v37 }
 0x788   : > { %v1577_v38 = vpop.f32.mrf.mxu3  ;;  %v1591_v40 = vpop.f32.mrf.mxu0 }
 0x789   : > { %v1578_v39 = vadd.f32 %v2514_v34, %v1577_v38 }
 0x78a   : > { %1726 = vmatpush.bf16.msra.mxu1 %v2346_v51 }
 0x78b   : > { %v1592_v41 = vadd.f32 %v1591_v40, %v1578_v39  ;;  %v1676_v39 = vld [vmem:[#allocation7 + $0xc] sm:$0x1] }
 0x78d   : > { %v1595_v42 = vadd.f32 %v1592_v41, %v3303_v2 }
 0x78e   : > { %1727 = vmatpush.bf16.msra.mxu1 %v2345_v52 }
 0x78f   : > { %1600 = vadd.xlane.f32.xlu2 %v1595_v42 }
 0x792   : > { %1728 = vmatpush.bf16.msra.mxu1 %v2344_v54 }
 0x796   : > { %1729 = vmatpush.bf16.msra.mxu1 %v2343_v56 }
 0x79a   : > { %1730 = vmatpush.bf16.msra.mxu1 %v2342_v58 }
 0x79e   : > { %1731 = vmatpush.bf16.msra.mxu1 %v2341_v0 }
 0x7a2   : > { %1732 = vmatpush.bf16.msra.mxu1 %v2340_v4 }
 0x7fa   : > { %v1599_v43 = vpop.xlane.xlu1 %1598 }
 0x7fb   : > { %v1602_v44 = vmul.f32 %v1599_v43, %v3270_v26 }
 0x7fd   : > { %v1604_v45 = vsub.f32 %v1594_v37, %v1602_v44 }
 0x7ff   : > { %v1606_v46 = vmul.f32 %v1604_v45, %v1604_v45 }
 0x801   : > { %1608 = vadd.xlane.f32.xlu0 %v1606_v46 }
 0x802   : > { %v1601_v47 = vpop.xlane.xlu2 %1600 }
 0x803   : > { %v1603_v48 = vmul.f32 %v1601_v47, %v3270_v26 }
 0x805   : > { %v1605_v49 = vsub.f32 %v1595_v42, %v1603_v48 }
 0x807   : > { %v1607_v50 = vmul.f32 %v1605_v49, %v1605_v49 }
 0x809   : > { %1610 = vadd.xlane.f32.xlu1 %v1607_v50 }
 0x874   : > { %v1609_v53 = vpop.xlane.xlu0 %1608 }
 0x875   : > { %v1612_v2 = vmul.f32 %v1609_v53, %v3270_v26 }
 0x877   : > { %v1614_v55 = vadd.f32 1e-05, %v1612_v2 }
 0x879   : > { %2551 = vrsqrt.f32 %v1614_v55  ;;  %vm1622_vm1 = vweird.f32 %v1614_v55 }
 0x87c   : > { %v1611_v57 = vpop.xlane.xlu1 %1610 }
 0x87d   : > { %v1613_v59 = vmul.f32 %v1611_v57, %v3270_v26  ;;  %v2994_v26 = vmov 16.0  }
 0x87f   : > { %v2552_v60 = vpop.eup %2551  ;;  %v1615_v61 = vadd.f32 1e-05, %v1613_v59 }
 0x880   : > { %v1617_v62 = vmul.f32 %v2552_v60, %v1614_v55  ;;  %vm1623_vm0 = vweird.f32 %v2552_v60 }
 0x881   : > { %2553 = vrsqrt.f32 %v1615_v61  ;;  %vm1624_vm2 = vmor %vm1622_vm1, %vm1623_vm0  ;;  %vm1632_vm4 = vweird.f32 %v1615_v61 }
 0x882   : > { %v1618_v1 = vmul.f32 %v2552_v60, %v1617_v62  ;;  %2555 = vrcp.f32 %v2994_v26 }
 0x884   : > { %v1619_v3 = vmul.f32 0.5, %v1618_v1 }
 0x886   : > { %v1620_v6 = vsub.f32 1.5, %v1619_v3 }
 0x887   : > { %v2554_v15 = vpop.eup %2553 }
 0x888   : > { %v1621_v7 = vmul.f32 %v2552_v60, %v1620_v6  ;;  %v1627_v19 = vmul.f32 %v2554_v15, %v1615_v61  ;;  %vm1633_vm3 = vweird.f32 %v2554_v15  ;;  %v2556_v17 = vpop.eup %2555 }
 0x889   : > { %vm1634_vm5 = vmor %vm1632_vm4, %vm1633_vm3  ;;  %v1652_v23 = vmul.f32 16.0, %v2556_v17  ;;  %vm1656_vm6 = vweird.f32 %v2556_v17 }
 0x88a   : > { %v1628_v9 = vmul.f32 %v2554_v15, %v1627_v19  ;;  %v1625_v10 = vsel %vm1624_vm2, %v2552_v60, %v1621_v7 }
 0x88b   : > { %v1636_v14 = vmul.f32 %v1625_v10, %v1604_v45  ;;  %v1653_v28 = vsub.f32 1.0, %v1652_v23 }
 0x88c   : > { %v1629_v11 = vmul.f32 0.5, %v1628_v9 }
 0x88d   : > { %v1639_v21 = vmul.f32 %v2515_v13, %v1636_v14  ;;  %v1654_v31 = vmul.f32 %v2556_v17, %v1653_v28 }
 0x88e   : > { %v1630_v12 = vsub.f32 1.5, %v1629_v11 }
 0x88f   : > { %v1642_v25 = vadd.f32 %v2516_v20, %v1639_v21  ;;  %v1655_v34 = vadd.f32 %v2556_v17, %v1654_v31 }
 0x890   : > { %v1631_v16 = vmul.f32 %v2554_v15, %v1630_v12 }
 0x891   : > { %v1657_v36 = vsel %vm1656_vm6, %v2556_v17, %v1655_v34 }
 0x892   : > { %v1635_v18 = vsel %vm1634_vm5, %v2554_v15, %v1631_v16 }
 0x893   : > { %v1637_v22 = vmul.f32 %v1635_v18, %v1605_v49 }
 0x895   : > { %v1640_v24 = vmul.f32 %v2515_v13, %v1637_v22 }
 0x897   : > { %v1643_v27 = vadd.f32 %v2516_v20, %v1640_v24 }
 0x899   : > { %v1644_v30 = vadd.f32 %v1643_v27, %v1642_v25 }
 0x89b   : > { %v1645_v29 = vrot.slane %v1644_v30, 4 }
 0x89d   : > { %v1646_v5 = vadd.f32 %v1645_v29, %v1644_v30 }
 0x89f   : > { %v1647_v32 = vrot.slane %v1646_v5, 2 }
 0x8a1   : > { %v1648_v35 = vadd.f32 %v1647_v32, %v1646_v5 }
 0x8a3   : > { %v1649_v8 = vrot.slane %v1648_v35, 1 }
 0x8a5   : > { %v1650_v33 = vadd.f32 %v1649_v8, %v1648_v35 }
 0x8a7   : > { %v1658_v37 = vmul.f32 %v1657_v36, %v1650_v33 }
 0x8a9   : > { %v1659_v38 = vpack.c.bf16 %v1658_v37, %v1658_v37 }
 0x8ab   : > { %1733 = vmatmul.bf16.vlgmr.msra.gmra.mxu1 %v1659_v38 }
 0x928   : > { %v1734_v40 = vpop.f32.mrf.mxu1 }
 0x929   : > { %v1735_v41 = vadd.f32 %v1734_v40, %v1676_v39 }
 0x92b   : > { %v1738_v42 = vperm.slane %v1735_v41, 0 }
 0x92d   : > { %1739 = vst [vmem:[%s613_s26] sm:$0xff] %v1738_v42 }
 0x930   : > { %v1736_v43 = vpop.f32.mrf.mxu1 }
 0x931 PF: > { %p28_p3 = scmp.ge.s32.totalorder %s3184_s29, 4   ;;  %s3377_s21 = smov %s2967_s22 }
 0x932   : > { %s3378_s22 = smov %s2971_s23  ;;  %s3379_s23 = smov %s3195_s3 }
 0x933   : > { %s3380_s24 = smov %s3184_s29  ;;  %30 = sbr.rel (!%p28_p3) target bundleno = 14 (0xe), region = 152 }
 0x938   :  { %1759 = vsyncpa [#allocation3], 1 }
 0x939   :  { %1761 = vsyncpa [#allocation3 + $0x1], 1 }
 0x93a   :  { %1762 = vsyncpa [#allocation5], 1 }
 0x93b   :  { %1763 = vsyncpa [#allocation8], 1 }
 0x93c   :  { %1764 = vsyncpa [#allocation11], 1 }
 0x93d   :  { %1765 = vsyncpa [#allocation14], 1 }
 0x93e   :  { %1766 = vsyncpa [#allocation17], 1 }
 0x93f   :  { %1767 = vsyncpa [#allocation20], 1 }

</bundles_post_ra>
